<compile_context>
chip_gen: v5e
topology: v5e:2x2
jax: 0.10.0
libtpu: 0.0.40
codegen_flags: <defaults>
</compile_context>

<pallas_src>
import jax
import jax.numpy as jnp
from jax.experimental import pallas as pl
from jax.experimental.pallas import tpu as pltpu


LANE = 128                              # vreg lane width; feature dims padded to this


def _round_up(x, m):
    return (x + m - 1) // m * m


def _gen_aware_vmem_limit():
    """v7x: 64 MiB physical/TC -> ~48 MiB cap; v5e/v6e: 128 MiB -> ~96 MiB."""
    try:
        cap = int(pltpu.get_tpu_info().vmem_capacity_bytes)
    except Exception:                    # unknown generation -> safe everywhere
        cap = 64 * 1024 * 1024
    return int(min(cap * 3 // 4, 100 * 1024 * 1024))


_VMEM_LIMIT = _gen_aware_vmem_limit()


def _pick_row_block(nrows, row_bytes, target=4 << 20):
    """Row-block for 'parallel' grids: full if small, else a multiple of 8
    dividing nrows and targeting a few MiB per grid step (>=512 rows at real
    sizes amortizes the ~0.35us/step pipeline overhead)."""
    if nrows <= 8 or nrows * row_bytes <= target:
        return nrows
    cand = min(nrows, max(8, (target // max(row_bytes, 1)) // 8 * 8))
    cand = (cand // 8) * 8
    while cand >= 8:
        if nrows % cand == 0:
            return cand
        cand -= 8
    return nrows


def _ln_rows(x, g, b, eps=1e-5):
    """Row-wise LayerNorm in f32 (matches nn.LayerNorm, eps=1e-5)."""
    mean = jnp.mean(x, axis=-1, keepdims=True)
    xc = x - mean
    var = jnp.mean(xc * xc, axis=-1, keepdims=True)
    return xc * jax.lax.rsqrt(var + eps) * g + b


# ----------------------------------------------------------------------------
# 1) Tiled bf16 matmul (MXU)
# ----------------------------------------------------------------------------
def _matmul_kernel_noacc(a_ref, b_ref, o_ref):
    o_ref[...] = jnp.dot(a_ref[...], b_ref[...],
                         preferred_element_type=jnp.float32).astype(o_ref.dtype)


def _matmul_kernel_acc(a_ref, b_ref, o_ref, acc_ref):
    @pl.when(pl.program_id(2) == 0)
    def _():
        acc_ref[...] = jnp.zeros_like(acc_ref)

    acc_ref[...] += jnp.dot(a_ref[...], b_ref[...],
                            preferred_element_type=jnp.float32)

    @pl.when(pl.program_id(2) == pl.num_programs(2) - 1)
    def _():
        o_ref[...] = acc_ref[...].astype(o_ref.dtype)


def pallas_matmul(a, b, *, out_dtype=jnp.bfloat16, tm=512, tn=512, tk=2048):
    """(M, K) @ (K, N) -> (M, N), bf16 operands into the MXU, f32 accumulate.

    Row tile is 16-aligned (bf16 packs 16 rows/vreg).  If K fits in one tile
    the K grid collapses: no K zero-padding, no VMEM accumulator, output
    written once.  Otherwise a 3-D grid with an f32 accumulator and
    Buffered(3) on the K-streamed RHS (hides DMA exposure on v5e).
    """
    M, K = a.shape
    K2, N = b.shape
    assert K == K2
    a = a.astype(jnp.bfloat16)
    b = b.astype(jnp.bfloat16)

    tm = min(tm, _round_up(M, 16))
    tn = min(tn, _round_up(N, LANE))
    Mp, Np = _round_up(M, tm), _round_up(N, tn)

    if K <= tk:
        tk, Kp = K, K                    # full-K: no padding, single K step
    else:
        tk = _round_up(tk, LANE)
        Kp = _round_up(K, tk)
    kt = Kp // tk

    if (Mp, Kp) != (M, K):
        a = jnp.pad(a, ((0, Mp - M), (0, Kp - K)))
    if (Kp, Np) != (K, N):
        b = jnp.pad(b, ((0, Kp - K), (0, Np - N)))

    if kt == 1:
        out = pl.pallas_call(
            _matmul_kernel_noacc,
            out_shape=jax.ShapeDtypeStruct((Mp, Np), out_dtype),
            grid_spec=pltpu.PrefetchScalarGridSpec(
                num_scalar_prefetch=0,
                grid=(Mp // tm, Np // tn),
                in_specs=[pl.BlockSpec((tm, Kp), lambda i, j: (i, 0)),
                          pl.BlockSpec((Kp, tn), lambda i, j: (0, j))],
                out_specs=pl.BlockSpec((tm, tn), lambda i, j: (i, j))),
            compiler_params=pltpu.CompilerParams(
                dimension_semantics=("parallel", "parallel"),
                vmem_limit_bytes=_VMEM_LIMIT),
        )(a, b)
    else:
        if kt >= 3:
            b_spec = pl.BlockSpec((tk, tn), lambda i, j, k: (k, j),
                                  pipeline_mode=pl.Buffered(3))
        else:
            b_spec = pl.BlockSpec((tk, tn), lambda i, j, k: (k, j))
        out = pl.pallas_call(
            _matmul_kernel_acc,
            out_shape=jax.ShapeDtypeStruct((Mp, Np), out_dtype),
            grid_spec=pltpu.PrefetchScalarGridSpec(
                num_scalar_prefetch=0,
                grid=(Mp // tm, Np // tn, kt),
                in_specs=[pl.BlockSpec((tm, tk), lambda i, j, k: (i, k)),
                          b_spec],
                out_specs=pl.BlockSpec((tm, tn), lambda i, j, k: (i, j)),
                scratch_shapes=[pltpu.VMEM((tm, tn), jnp.float32)]),
            compiler_params=pltpu.CompilerParams(
                dimension_semantics=("parallel", "parallel", "arbitrary"),
                vmem_limit_bytes=_VMEM_LIMIT),
        )(a, b)

    if (Mp, Np) != (M, N):
        out = out[:M, :N]
    return out


# ----------------------------------------------------------------------------
# 2) Fused CLS-concat + positional-embedding add + ln_pre
# ----------------------------------------------------------------------------
def tokens_ln_pre(emb, class_emb, vis_pos, gamma, beta):
    """emb: (B, n, W) bf16 patch embeddings.

    Emits (patch_tokens (B,n,W), cls_tokens (B,W)) post-ln_pre.  The CLS row
    is built in-kernel (no wrapper concatenate / full-token HBM round trip
    just to read row 0), and patch tokens stay resident for the (TODO)
    transformer blocks.
    """
    B, n, W = emb.shape
    Bb = _pick_row_block(B, n * W * 4)

    cls = class_emb.reshape(1, W)
    pos0 = vis_pos[0:1, :]               # (1, W)  CLS position
    posr = vis_pos[1:, :]                # (n, W)  patch positions

    def kernel(emb_ref, cls_ref, p0_ref, pr_ref, g_ref, b_ref,
               ptok_ref, ctok_ref):
        g = g_ref[...]
        b = b_ref[...]
        x = emb_ref[...].astype(jnp.float32) + pr_ref[...].astype(jnp.float32)[None]
        ptok_ref[...] = _ln_rows(x, g, b).astype(ptok_ref.dtype)
        c = cls_ref[...].astype(jnp.float32) + p0_ref[...].astype(jnp.float32)
        c = _ln_rows(c, g, b)                                   # (1, W), batch-invariant
        ctok_ref[...] = jnp.broadcast_to(c, ctok_ref.shape).astype(ctok_ref.dtype)

    return pl.pallas_call(
        kernel,
        out_shape=(jax.ShapeDtypeStruct((B, n, W), jnp.bfloat16),
                   jax.ShapeDtypeStruct((B, W), jnp.bfloat16)),
        grid_spec=pltpu.PrefetchScalarGridSpec(
            num_scalar_prefetch=0,
            grid=(B // Bb,),
            in_specs=[pl.BlockSpec((Bb, n, W), lambda i: (i, 0, 0)),
                      pl.BlockSpec((1, W), lambda i: (0, 0)),
                      pl.BlockSpec((1, W), lambda i: (0, 0)),
                      pl.BlockSpec((n, W), lambda i: (0, 0)),
                      pl.BlockSpec((1, W), lambda i: (0, 0)),
                      pl.BlockSpec((1, W), lambda i: (0, 0))],
            out_specs=(pl.BlockSpec((Bb, n, W), lambda i: (i, 0, 0)),
                       pl.BlockSpec((Bb, W), lambda i: (i, 0)))),
        compiler_params=pltpu.CompilerParams(
            dimension_semantics=("parallel",),
            vmem_limit_bytes=_VMEM_LIMIT),
    )(emb, cls, pos0, posr, gamma.reshape(1, W), beta.reshape(1, W))


# ----------------------------------------------------------------------------
# 3) Fused text tail: ln_final + txt_proj + L2-normalize (class rows padded
#    to 128 so everything downstream stays lane-dense)
# ----------------------------------------------------------------------------
def text_ln_proj_norm(feats_p, gamma, beta, w, num_classes):
    Cp, Wt = feats_p.shape
    D = w.shape[1]
    Ct = _pick_row_block(Cp, (Wt + 2 * D) * 4)

    def kernel(x_ref, g_ref, b_ref, w_ref, o32_ref, o16_ref):
        x = x_ref[...].astype(jnp.float32)
        y = _ln_rows(x, g_ref[...], b_ref[...])
        t = jnp.dot(y.astype(jnp.bfloat16), w_ref[...],
                    preferred_element_type=jnp.float32)
        # No eps: matches PyTorch `x / x.norm(dim=-1, keepdim=True)` behavior
        # (an all-zero real row would produce inf/NaN, same as the reference).
        tn = t * jax.lax.rsqrt(jnp.sum(t * t, axis=-1, keepdims=True))
        row = (jax.lax.broadcasted_iota(jnp.int32, tn.shape, 0)
               + pl.program_id(0) * Ct)
        tn = jnp.where(row < num_classes, tn, 0.0)              # zero the pad rows
        o32_ref[...] = tn                                       # module output (f32)
        o16_ref[...] = tn.astype(jnp.bfloat16)                  # MXU operand for head

    return pl.pallas_call(
        kernel,
        out_shape=(jax.ShapeDtypeStruct((Cp, D), jnp.float32),
                   jax.ShapeDtypeStruct((Cp, D), jnp.bfloat16)),
        grid_spec=pltpu.PrefetchScalarGridSpec(
            num_scalar_prefetch=0,
            grid=(Cp // Ct,),
            in_specs=[pl.BlockSpec((Ct, Wt), lambda i: (i, 0)),
                      pl.BlockSpec((1, Wt), lambda i: (0, 0)),
                      pl.BlockSpec((1, Wt), lambda i: (0, 0)),
                      pl.BlockSpec((Wt, D), lambda i: (0, 0))],
            out_specs=(pl.BlockSpec((Ct, D), lambda i: (i, 0)),
                       pl.BlockSpec((Ct, D), lambda i: (i, 0)))),
        compiler_params=pltpu.CompilerParams(
            dimension_semantics=("parallel",),
            vmem_limit_bytes=_VMEM_LIMIT),
    )(feats_p.astype(jnp.bfloat16), gamma.reshape(1, Wt), beta.reshape(1, Wt),
      w.astype(jnp.bfloat16))


# ----------------------------------------------------------------------------
# 4) Fused head: ln_post + vis_proj + image L2-norm + scaled logits matmul
# ----------------------------------------------------------------------------
def clip_head(cls_tok, gamma, beta, w, txt_bf16, scale):
    """cls_tok: (B, W) post-ln_pre CLS rows; txt_bf16: (Cp, D) normalized text
    features; scale: (1,) f32 = exp(logit_scale) (precomputed in the wrapper).
    Returns (logits (B, Cp) f32, image_features (B, D) f32).
    """
    B, W = cls_tok.shape
    D = w.shape[1]
    Cp = txt_bf16.shape[0]
    Bt = _pick_row_block(B, (W + D + Cp) * 4)

    def kernel(cls_ref, g_ref, b_ref, w_ref, txt_ref, s_ref,
               logits_ref, imgn_ref):
        x = cls_ref[...].astype(jnp.float32)
        y = _ln_rows(x, g_ref[...], b_ref[...])
        feat = jnp.dot(y.astype(jnp.bfloat16), w_ref[...],
                       preferred_element_type=jnp.float32)       # (Bt, D)
        img_n = feat * jax.lax.rsqrt(jnp.sum(feat * feat, axis=-1, keepdims=True))
        imgn_ref[...] = img_n
        # logits = exp(logit_scale) * img_n @ txt_n.T : NT contraction on the
        # MXU, output lane-dense on the 128-padded class dim.
        logits_ref[...] = s_ref[0] * jax.lax.dot_general(
            img_n.astype(jnp.bfloat16), txt_ref[...],
            dimension_numbers=(((1,), (1,)), ((), ())),
            preferred_element_type=jnp.float32)

    return pl.pallas_call(
        kernel,
        out_shape=(jax.ShapeDtypeStruct((B, Cp), jnp.float32),
                   jax.ShapeDtypeStruct((B, D), jnp.float32)),
        grid_spec=pltpu.PrefetchScalarGridSpec(
            num_scalar_prefetch=0,
            grid=(B // Bt,),
            in_specs=[pl.BlockSpec((Bt, W), lambda i: (i, 0)),
                      pl.BlockSpec((1, W), lambda i: (0, 0)),
                      pl.BlockSpec((1, W), lambda i: (0, 0)),
                      pl.BlockSpec((W, D), lambda i: (0, 0)),
                      pl.BlockSpec((Cp, D), lambda i: (0, 0)),
                      pl.BlockSpec(memory_space=pltpu.MemorySpace.SMEM)],
            out_specs=(pl.BlockSpec((Bt, Cp), lambda i: (i, 0)),
                       pl.BlockSpec((Bt, D), lambda i: (i, 0)))),
        compiler_params=pltpu.CompilerParams(
            dimension_semantics=("parallel",),
            vmem_limit_bytes=_VMEM_LIMIT),
    )(cls_tok.astype(jnp.bfloat16), gamma.reshape(1, W), beta.reshape(1, W),
      w.astype(jnp.bfloat16), txt_bf16, scale)


# ----------------------------------------------------------------------------
# Encoders / forward
# ----------------------------------------------------------------------------
def encode_image(x, params, patch=4):
    """x: (B, C, H, W) NCHW f32 -> (B, vis_width) bf16 post-ln_pre CLS rows."""
    B, C, H, W = x.shape
    p = patch
    # Patchify in bf16; (C, ph, pw) row-major order is bit-exact with
    # nn.Conv2d(stride=patch, bias=False).
    xp = x.astype(jnp.bfloat16).reshape(B, C, H // p, p, W // p, p)
    xp = xp.transpose(0, 2, 4, 1, 3, 5)
    n = (H // p) * (W // p)
    xp = xp.reshape(B * n, C * p * p)

    width = params["patch_w"].shape[1]
    emb = pallas_matmul(xp, params["patch_w"]).reshape(B, n, width)

    patch_tokens, cls_tok = tokens_ln_pre(
        emb, params["class_emb"], params["vis_pos"],
        params["ln_pre_g"], params["ln_pre_b"])
    # TODO(synk): CLIP's vision-transformer residual attention blocks are
    # omitted (no pretrained weights); `patch_tokens` stays resident for them
    # and the CLS extraction moves after those blocks once they land.
    del patch_tokens
    return cls_tok


def new_clip_forward(x, labels, params):
    num_classes = labels.shape[0]
    cls_tok = encode_image(x, params)                           # (B, W) bf16

    # ---- text path (encode_text) ---------------------------------------
    # TODO(synk): token-embedding lookup + EOT argmax gather are tiny XLA glue.
    t = jnp.take(params["tok_emb"], labels, axis=0) + params["txt_pos"][None]
    # TODO(synk): CLIP's text-transformer residual attention blocks omitted.
    eot = jnp.argmax(labels, axis=-1)
    feats = t[jnp.arange(num_classes), eot]                     # (C, W_txt)
    Cp = _round_up(num_classes, LANE)
    feats_p = jnp.pad(feats, ((0, Cp - num_classes), (0, 0)))   # tiny, lane-dense

    txt_n_f32, txt_n_bf16 = text_ln_proj_norm(
        feats_p, params["ln_final_g"], params["ln_final_b"],
        params["txt_proj"], num_classes)

    # ---- head -----------------------------------------------------------
    scale = jnp.exp(params["logit_scale"]).reshape(1).astype(jnp.float32)
    logits_p, img_n = clip_head(cls_tok, params["ln_post_g"], params["ln_post_b"],
                                params["vis_proj"], txt_n_bf16, scale)

    logits = logits_p[:, :num_classes]                          # drop zero pad cols
    return logits, img_n, txt_n_f32[:num_classes]


# ----------------------------------------------------------------------------
# Deterministic parameter construction + demo
# ----------------------------------------------------------------------------
def make_params(key, *, in_ch=3, patch=4, img_size=16,
                vis_width=128, txt_width=128, embed_dim=128,
                vocab=64, ctx_len=8):
    n_patches = (img_size // patch) ** 2
    ks = jax.random.split(key, 7)
    s = 0.02
    bf = jnp.bfloat16
    return {
        # Weights stored bf16 (MXU-native); LayerNorm affine params f32.
        "patch_w":   (s * jax.random.normal(ks[0], (in_ch * patch * patch, vis_width), jnp.float32)).astype(bf),
        "class_emb": (s * jax.random.normal(ks[1], (vis_width,), jnp.float32)).astype(bf),
        "vis_pos":   (s * jax.random.normal(ks[2], (n_patches + 1, vis_width), jnp.float32)).astype(bf),
        "ln_pre_g":  jnp.ones((vis_width,), jnp.float32),
        "ln_pre_b":  jnp.zeros((vis_width,), jnp.float32),
        "ln_post_g": jnp.ones((vis_width,), jnp.float32),
        "ln_post_b": jnp.zeros((vis_width,), jnp.float32),
        "vis_proj":  (s * jax.random.normal(ks[3], (vis_width, embed_dim), jnp.float32)).astype(bf),
        "tok_emb":   (s * jax.random.normal(ks[4], (vocab, txt_width), jnp.float32)).astype(bf),
        "txt_pos":   (s * jax.random.normal(ks[5], (ctx_len, txt_width), jnp.float32)).astype(bf),
        "ln_final_g": jnp.ones((txt_width,), jnp.float32),
        "ln_final_b": jnp.zeros((txt_width,), jnp.float32),
        "txt_proj":  (s * jax.random.normal(ks[6], (txt_width, embed_dim), jnp.float32)).astype(bf),
        # CLIP init: logit_scale = log(1 / 0.07)
        "logit_scale": jnp.asarray(jnp.log(1.0 / 0.07), jnp.float32),
    }


if __name__ == "__main__":
    key = jax.random.PRNGKey(0)
    k_x, k_lab, k_p = jax.random.split(key, 3)

    B, C, H, W = 4, 3, 16, 16                  # NCHW images
    num_classes, ctx_len, vocab = 5, 8, 64
    embed_dim = 128                            # lane-padded feature width

    x = jax.random.normal(k_x, (B, C, H, W), jnp.float32)
    labels = jax.random.randint(k_lab, (num_classes, ctx_len), 0, vocab, jnp.int32)
    params = make_params(k_p, in_ch=C, img_size=H, ctx_len=ctx_len, vocab=vocab,
                         embed_dim=embed_dim)

    fwd = jax.jit(new_clip_forward)
    logits, img_feats, txt_feats = fwd(x, labels, params)
    jax.block_until_ready((logits, img_feats, txt_feats))

    assert logits.shape == (B, num_classes)
    assert img_feats.shape == (B, embed_dim)
    assert txt_feats.shape == (num_classes, embed_dim)
    # normalized features must be unit-norm (computed in f32 inside kernels)
    assert bool(jnp.allclose(jnp.linalg.norm(img_feats, axis=-1), 1.0, atol=1e-4))
    assert bool(jnp.allclose(jnp.linalg.norm(txt_feats, axis=-1), 1.0, atol=1e-4))

    print("KERNEL_OK")
</pallas_src>

<mosaic_0001>
module attributes {stable_mosaic.version = 11 : i64} {
  func.func @kernel(%arg0: i32, %arg1: memref<4x16x128xbf16, #tpu.memory_space<vmem>>, %arg2: memref<1x128xbf16, #tpu.memory_space<vmem>>, %arg3: memref<1x128xbf16, #tpu.memory_space<vmem>>, %arg4: memref<16x128xbf16, #tpu.memory_space<vmem>>, %arg5: memref<1x128xf32, #tpu.memory_space<vmem>>, %arg6: memref<1x128xf32, #tpu.memory_space<vmem>>, %arg7: memref<4x16x128xbf16, #tpu.memory_space<vmem>>, %arg8: memref<4x128xbf16, #tpu.memory_space<vmem>>) attributes {dimension_semantics = [#tpu.dimension_semantics<parallel>], iteration_bounds = array<i64: 1>, scalar_prefetch = 0 : i64, scratch_operands = 0 : i64, tpu.core_type = #tpu.core_type<tc>, window_params = [{transform_indices = @transform_0, window_bounds = array<i64: 4, 16, 128>}, {pipeline_mode = #tpu.pipeline_mode<synchronous>, transform_indices = @transform_1, window_bounds = array<i64: 1, 128>}, {pipeline_mode = #tpu.pipeline_mode<synchronous>, transform_indices = @transform_2, window_bounds = array<i64: 1, 128>}, {pipeline_mode = #tpu.pipeline_mode<synchronous>, transform_indices = @transform_3, window_bounds = array<i64: 16, 128>}, {pipeline_mode = #tpu.pipeline_mode<synchronous>, transform_indices = @transform_4, window_bounds = array<i64: 1, 128>}, {pipeline_mode = #tpu.pipeline_mode<synchronous>, transform_indices = @transform_5, window_bounds = array<i64: 1, 128>}, {transform_indices = @transform_6, window_bounds = array<i64: 4, 16, 128>}, {transform_indices = @transform_7, window_bounds = array<i64: 4, 128>}]} {
    %c0 = arith.constant 0 : index
    %c0_0 = arith.constant 0 : index
    %0 = vector.load %arg5[%c0, %c0_0] : memref<1x128xf32, #tpu.memory_space<vmem>>, vector<1x128xf32>
    %c0_1 = arith.constant 0 : index
    %c0_2 = arith.constant 0 : index
    %1 = vector.load %arg6[%c0_1, %c0_2] : memref<1x128xf32, #tpu.memory_space<vmem>>, vector<1x128xf32>
    %c0_3 = arith.constant 0 : index
    %c0_4 = arith.constant 0 : index
    %c0_5 = arith.constant 0 : index
    %2 = vector.load %arg1[%c0_3, %c0_4, %c0_5] : memref<4x16x128xbf16, #tpu.memory_space<vmem>>, vector<4x16x128xbf16>
    %3 = arith.extf %2 : vector<4x16x128xbf16> to vector<4x16x128xf32>
    %c0_6 = arith.constant 0 : index
    %c0_7 = arith.constant 0 : index
    %4 = vector.load %arg4[%c0_6, %c0_7] : memref<16x128xbf16, #tpu.memory_space<vmem>>, vector<16x128xbf16>
    %5 = arith.extf %4 : vector<16x128xbf16> to vector<16x128xf32>
    %6 = vector.shape_cast %5 : vector<16x128xf32> to vector<1x16x128xf32>
    %7 = vector.broadcast %6 : vector<1x16x128xf32> to vector<4x16x128xf32>
    %8 = arith.addf %3, %7 : vector<4x16x128xf32>
    %cst = arith.constant dense<0.000000e+00> : vector<4x16xf32>
    %9 = vector.multi_reduction <add>, %8, %cst [2] : vector<4x16x128xf32> to vector<4x16xf32>
    %10 = vector.shape_cast %9 : vector<4x16xf32> to vector<4x16x1xf32>
    %cst_8 = arith.constant 1.280000e+02 : f32
    %11 = vector.broadcast %cst_8 : f32 to vector<4x16x1xf32>
    %12 = arith.divf %10, %11 : vector<4x16x1xf32>
    %13 = vector.broadcast %12 : vector<4x16x1xf32> to vector<4x16x128xf32>
    %14 = arith.subf %8, %13 : vector<4x16x128xf32>
    %15 = arith.mulf %14, %14 : vector<4x16x128xf32>
    %cst_9 = arith.constant dense<0.000000e+00> : vector<4x16xf32>
    %16 = vector.multi_reduction <add>, %15, %cst_9 [2] : vector<4x16x128xf32> to vector<4x16xf32>
    %17 = vector.shape_cast %16 : vector<4x16xf32> to vector<4x16x1xf32>
    %cst_10 = arith.constant 1.280000e+02 : f32
    %18 = vector.broadcast %cst_10 : f32 to vector<4x16x1xf32>
    %19 = arith.divf %17, %18 : vector<4x16x1xf32>
    %cst_11 = arith.constant 9.99999974E-6 : f32
    %20 = vector.broadcast %cst_11 : f32 to vector<4x16x1xf32>
    %21 = arith.addf %19, %20 : vector<4x16x1xf32>
    %22 = math.rsqrt %21 : vector<4x16x1xf32>
    %23 = vector.broadcast %22 : vector<4x16x1xf32> to vector<4x16x128xf32>
    %24 = arith.mulf %14, %23 : vector<4x16x128xf32>
    %25 = vector.shape_cast %0 : vector<1x128xf32> to vector<1x1x128xf32>
    %26 = vector.broadcast %25 : vector<1x1x128xf32> to vector<4x16x128xf32>
    %27 = arith.mulf %24, %26 : vector<4x16x128xf32>
    %28 = vector.shape_cast %1 : vector<1x128xf32> to vector<1x1x128xf32>
    %29 = vector.broadcast %28 : vector<1x1x128xf32> to vector<4x16x128xf32>
    %30 = arith.addf %27, %29 : vector<4x16x128xf32>
    %31 = arith.truncf %30 : vector<4x16x128xf32> to vector<4x16x128xbf16>
    %c0_12 = arith.constant 0 : index
    %c0_13 = arith.constant 0 : index
    %c0_14 = arith.constant 0 : index
    %32 = vector.load %arg7[%c0_12, %c0_13, %c0_14] : memref<4x16x128xbf16, #tpu.memory_space<vmem>>, vector<4x16x128xbf16>
    tpu.vector_store %arg7[%c0_12, %c0_13, %c0_14], %31 {strides = array<i32>} : memref<4x16x128xbf16, #tpu.memory_space<vmem>>, vector<4x16x128xbf16>,
    %c0_15 = arith.constant 0 : index
    %c0_16 = arith.constant 0 : index
    %33 = vector.load %arg2[%c0_15, %c0_16] : memref<1x128xbf16, #tpu.memory_space<vmem>>, vector<1x128xbf16>
    %34 = arith.extf %33 : vector<1x128xbf16> to vector<1x128xf32>
    %c0_17 = arith.constant 0 : index
    %c0_18 = arith.constant 0 : index
    %35 = vector.load %arg3[%c0_17, %c0_18] : memref<1x128xbf16, #tpu.memory_space<vmem>>, vector<1x128xbf16>
    %36 = arith.extf %35 : vector<1x128xbf16> to vector<1x128xf32>
    %37 = arith.addf %34, %36 : vector<1x128xf32>
    %cst_19 = arith.constant dense<0.000000e+00> : vector<1xf32>
    %38 = vector.multi_reduction <add>, %37, %cst_19 [1] : vector<1x128xf32> to vector<1xf32>
    %39 = vector.shape_cast %38 : vector<1xf32> to vector<1x1xf32>
    %cst_20 = arith.constant 1.280000e+02 : f32
    %40 = vector.broadcast %cst_20 : f32 to vector<1x1xf32>
    %41 = arith.divf %39, %40 : vector<1x1xf32>
    %42 = vector.broadcast %41 : vector<1x1xf32> to vector<1x128xf32>
    %43 = arith.subf %37, %42 : vector<1x128xf32>
    %44 = arith.mulf %43, %43 : vector<1x128xf32>
    %cst_21 = arith.constant dense<0.000000e+00> : vector<1xf32>
    %45 = vector.multi_reduction <add>, %44, %cst_21 [1] : vector<1x128xf32> to vector<1xf32>
    %46 = vector.shape_cast %45 : vector<1xf32> to vector<1x1xf32>
    %cst_22 = arith.constant 1.280000e+02 : f32
    %47 = vector.broadcast %cst_22 : f32 to vector<1x1xf32>
    %48 = arith.divf %46, %47 : vector<1x1xf32>
    %cst_23 = arith.constant 9.99999974E-6 : f32
    %49 = vector.broadcast %cst_23 : f32 to vector<1x1xf32>
    %50 = arith.addf %48, %49 : vector<1x1xf32>
    %51 = math.rsqrt %50 : vector<1x1xf32>
    %52 = vector.broadcast %51 : vector<1x1xf32> to vector<1x128xf32>
    %53 = arith.mulf %43, %52 : vector<1x128xf32>
    %54 = arith.mulf %53, %0 : vector<1x128xf32>
    %55 = arith.addf %54, %1 : vector<1x128xf32>
    %56 = vector.shape_cast %55 : vector<1x128xf32> to vector<1x128xf32>
    %57 = vector.broadcast %56 : vector<1x128xf32> to vector<4x128xf32>
    %58 = arith.truncf %57 : vector<4x128xf32> to vector<4x128xbf16>
    %c0_24 = arith.constant 0 : index
    %c0_25 = arith.constant 0 : index
    %59 = vector.load %arg8[%c0_24, %c0_25] : memref<4x128xbf16, #tpu.memory_space<vmem>>, vector<4x128xbf16>
    tpu.vector_store %arg8[%c0_24, %c0_25], %58 {strides = array<i32>} : memref<4x128xbf16, #tpu.memory_space<vmem>>, vector<4x128xbf16>,
    return
  }
  func.func @transform_0(%arg0: i32) -> (i32, i32, i32) {
    %c0_i32 = arith.constant 0 : i32
    %c0_i32_0 = arith.constant 0 : i32
    %c0_i32_1 = arith.constant 0 : i32
    return %arg0, %c0_i32, %c0_i32_0 : i32, i32, i32
  }
  func.func @transform_1(%arg0: i32) -> (i32, i32) {
    %c0_i32 = arith.constant 0 : i32
    %c0_i32_0 = arith.constant 0 : i32
    %c0_i32_1 = arith.constant 0 : i32
    return %c0_i32, %c0_i32_0 : i32, i32
  }
  func.func @transform_2(%arg0: i32) -> (i32, i32) {
    %c0_i32 = arith.constant 0 : i32
    %c0_i32_0 = arith.constant 0 : i32
    %c0_i32_1 = arith.constant 0 : i32
    return %c0_i32, %c0_i32_0 : i32, i32
  }
  func.func @transform_3(%arg0: i32) -> (i32, i32) {
    %c0_i32 = arith.constant 0 : i32
    %c0_i32_0 = arith.constant 0 : i32
    %c0_i32_1 = arith.constant 0 : i32
    return %c0_i32, %c0_i32_0 : i32, i32
  }
  func.func @transform_4(%arg0: i32) -> (i32, i32) {
    %c0_i32 = arith.constant 0 : i32
    %c0_i32_0 = arith.constant 0 : i32
    %c0_i32_1 = arith.constant 0 : i32
    return %c0_i32, %c0_i32_0 : i32, i32
  }
  func.func @transform_5(%arg0: i32) -> (i32, i32) {
    %c0_i32 = arith.constant 0 : i32
    %c0_i32_0 = arith.constant 0 : i32
    %c0_i32_1 = arith.constant 0 : i32
    return %c0_i32, %c0_i32_0 : i32, i32
  }
  func.func @transform_6(%arg0: i32) -> (i32, i32, i32) {
    %c0_i32 = arith.constant 0 : i32
    %c0_i32_0 = arith.constant 0 : i32
    %c0_i32_1 = arith.constant 0 : i32
    return %arg0, %c0_i32, %c0_i32_0 : i32, i32, i32
  }
  func.func @transform_7(%arg0: i32) -> (i32, i32) {
    %c0_i32 = arith.constant 0 : i32
    %c0_i32_0 = arith.constant 0 : i32
    return %arg0, %c0_i32 : i32, i32
  }
}

module attributes {stable_mosaic.version = 11 : i64} {
  func.func @_matmul_kernel_noacc(%arg0: i32, %arg1: i32, %arg2: memref<64x48xbf16, #tpu.memory_space<vmem>>, %arg3: memref<48x128xbf16, #tpu.memory_space<vmem>>, %arg4: memref<64x128xbf16, #tpu.memory_space<vmem>>) attributes {dimension_semantics = [#tpu.dimension_semantics<parallel>, #tpu.dimension_semantics<parallel>], iteration_bounds = array<i64: 1, 1>, scalar_prefetch = 0 : i64, scratch_operands = 0 : i64, tpu.core_type = #tpu.core_type<tc>, window_params = [{transform_indices = @transform_0, window_bounds = array<i64: 64, 48>}, {transform_indices = @transform_1, window_bounds = array<i64: 48, 128>}, {transform_indices = @transform_2, window_bounds = array<i64: 64, 128>}]} {
    %c0 = arith.constant 0 : index
    %c0_0 = arith.constant 0 : index
    %0 = vector.load %arg2[%c0, %c0_0] : memref<64x48xbf16, #tpu.memory_space<vmem>>, vector<64x48xbf16>
    %c0_1 = arith.constant 0 : index
    %c0_2 = arith.constant 0 : index
    %1 = vector.load %arg3[%c0_1, %c0_2] : memref<48x128xbf16, #tpu.memory_space<vmem>>, vector<48x128xbf16>
    %cst = arith.constant dense<0.000000e+00> : vector<64x128xf32>
    %2 = tpu.matmul %0, %1, %cst {dimension_numbers = #tpu.dot_dimension_numbers<[1], [0], [0], [1], [0, 0, 1, 1], [], []>} : vector<64x48xbf16>, vector<48x128xbf16>, vector<64x128xf32> -> vector<64x128xf32>
    %3 = arith.truncf %2 : vector<64x128xf32> to vector<64x128xbf16>
    %c0_3 = arith.constant 0 : index
    %c0_4 = arith.constant 0 : index
    %4 = vector.load %arg4[%c0_3, %c0_4] : memref<64x128xbf16, #tpu.memory_space<vmem>>, vector<64x128xbf16>
    tpu.vector_store %arg4[%c0_3, %c0_4], %3 {strides = array<i32>} : memref<64x128xbf16, #tpu.memory_space<vmem>>, vector<64x128xbf16>,
    return
  }
  func.func @transform_0(%arg0: i32, %arg1: i32) -> (i32, i32) {
    %c0_i32 = arith.constant 0 : i32
    %c0_i32_0 = arith.constant 0 : i32
    return %arg0, %c0_i32 : i32, i32
  }
  func.func @transform_1(%arg0: i32, %arg1: i32) -> (i32, i32) {
    %c0_i32 = arith.constant 0 : i32
    %c0_i32_0 = arith.constant 0 : i32
    return %c0_i32, %arg1 : i32, i32
  }
  func.func @transform_2(%arg0: i32, %arg1: i32) -> (i32, i32) {
    %c0_i32 = arith.constant 0 : i32
    return %arg0, %arg1 : i32, i32
  }
}

module attributes {stable_mosaic.version = 11 : i64} {
  func.func @kernel(%arg0: i32, %arg1: memref<128x128xbf16, #tpu.memory_space<vmem>>, %arg2: memref<1x128xf32, #tpu.memory_space<vmem>>, %arg3: memref<1x128xf32, #tpu.memory_space<vmem>>, %arg4: memref<128x128xbf16, #tpu.memory_space<vmem>>, %arg5: memref<128x128xf32, #tpu.memory_space<vmem>>, %arg6: memref<128x128xbf16, #tpu.memory_space<vmem>>) attributes {dimension_semantics = [#tpu.dimension_semantics<parallel>], iteration_bounds = array<i64: 1>, scalar_prefetch = 0 : i64, scratch_operands = 0 : i64, tpu.core_type = #tpu.core_type<tc>, window_params = [{transform_indices = @transform_0, window_bounds = array<i64: 128, 128>}, {pipeline_mode = #tpu.pipeline_mode<synchronous>, transform_indices = @transform_1, window_bounds = array<i64: 1, 128>}, {pipeline_mode = #tpu.pipeline_mode<synchronous>, transform_indices = @transform_2, window_bounds = array<i64: 1, 128>}, {pipeline_mode = #tpu.pipeline_mode<synchronous>, transform_indices = @transform_3, window_bounds = array<i64: 128, 128>}, {transform_indices = @transform_4, window_bounds = array<i64: 128, 128>}, {transform_indices = @transform_5, window_bounds = array<i64: 128, 128>}]} {
    %c0 = arith.constant 0 : index
    %c0_0 = arith.constant 0 : index
    %0 = vector.load %arg1[%c0, %c0_0] : memref<128x128xbf16, #tpu.memory_space<vmem>>, vector<128x128xbf16>
    %1 = arith.extf %0 : vector<128x128xbf16> to vector<128x128xf32>
    %c0_1 = arith.constant 0 : index
    %c0_2 = arith.constant 0 : index
    %2 = vector.load %arg2[%c0_1, %c0_2] : memref<1x128xf32, #tpu.memory_space<vmem>>, vector<1x128xf32>
    %c0_3 = arith.constant 0 : index
    %c0_4 = arith.constant 0 : index
    %3 = vector.load %arg3[%c0_3, %c0_4] : memref<1x128xf32, #tpu.memory_space<vmem>>, vector<1x128xf32>
    %cst = arith.constant dense<0.000000e+00> : vector<128xf32>
    %4 = vector.multi_reduction <add>, %1, %cst [1] : vector<128x128xf32> to vector<128xf32>
    %5 = vector.shape_cast %4 : vector<128xf32> to vector<128x1xf32>
    %cst_5 = arith.constant 1.280000e+02 : f32
    %6 = vector.broadcast %cst_5 : f32 to vector<128x1xf32>
    %7 = arith.divf %5, %6 : vector<128x1xf32>
    %8 = vector.broadcast %7 : vector<128x1xf32> to vector<128x128xf32>
    %9 = arith.subf %1, %8 : vector<128x128xf32>
    %10 = arith.mulf %9, %9 : vector<128x128xf32>
    %cst_6 = arith.constant dense<0.000000e+00> : vector<128xf32>
    %11 = vector.multi_reduction <add>, %10, %cst_6 [1] : vector<128x128xf32> to vector<128xf32>
    %12 = vector.shape_cast %11 : vector<128xf32> to vector<128x1xf32>
    %cst_7 = arith.constant 1.280000e+02 : f32
    %13 = vector.broadcast %cst_7 : f32 to vector<128x1xf32>
    %14 = arith.divf %12, %13 : vector<128x1xf32>
    %cst_8 = arith.constant 9.99999974E-6 : f32
    %15 = vector.broadcast %cst_8 : f32 to vector<128x1xf32>
    %16 = arith.addf %14, %15 : vector<128x1xf32>
    %17 = math.rsqrt %16 : vector<128x1xf32>
    %18 = vector.broadcast %17 : vector<128x1xf32> to vector<128x128xf32>
    %19 = arith.mulf %9, %18 : vector<128x128xf32>
    %20 = vector.broadcast %2 : vector<1x128xf32> to vector<128x128xf32>
    %21 = arith.mulf %19, %20 : vector<128x128xf32>
    %22 = vector.broadcast %3 : vector<1x128xf32> to vector<128x128xf32>
    %23 = arith.addf %21, %22 : vector<128x128xf32>
    %24 = arith.truncf %23 : vector<128x128xf32> to vector<128x128xbf16>
    %c0_9 = arith.constant 0 : index
    %c0_10 = arith.constant 0 : index
    %25 = vector.load %arg4[%c0_9, %c0_10] : memref<128x128xbf16, #tpu.memory_space<vmem>>, vector<128x128xbf16>
    %cst_11 = arith.constant dense<0.000000e+00> : vector<128x128xf32>
    %26 = tpu.matmul %24, %25, %cst_11 {dimension_numbers = #tpu.dot_dimension_numbers<[1], [0], [0], [1], [0, 0, 1, 1], [], []>} : vector<128x128xbf16>, vector<128x128xbf16>, vector<128x128xf32> -> vector<128x128xf32>
    %27 = arith.mulf %26, %26 : vector<128x128xf32>
    %cst_12 = arith.constant dense<0.000000e+00> : vector<128xf32>
    %28 = vector.multi_reduction <add>, %27, %cst_12 [1] : vector<128x128xf32> to vector<128xf32>
    %29 = vector.shape_cast %28 : vector<128xf32> to vector<128x1xf32>
    %30 = math.rsqrt %29 : vector<128x1xf32>
    %31 = vector.broadcast %30 : vector<128x1xf32> to vector<128x128xf32>
    %32 = arith.mulf %26, %31 : vector<128x128xf32>
    %33 = tpu.iota {dimensions = array<i32: 0>} : vector<128x128xi32>
    %c128_i32 = arith.constant 128 : i32
    %34 = arith.muli %arg0, %c128_i32 : i32
    %35 = vector.broadcast %34 : i32 to vector<128x128xi32>
    %36 = arith.addi %33, %35 : vector<128x128xi32>
    %c5_i32 = arith.constant 5 : i32
    %37 = vector.broadcast %c5_i32 : i32 to vector<128x128xi32>
    %38 = arith.cmpi slt, %36, %37 : vector<128x128xi32>
    %cst_13 = arith.constant 0.000000e+00 : f32
    %39 = vector.broadcast %cst_13 : f32 to vector<128x128xf32>
    %40 = arith.select %38, %32, %39 : vector<128x128xi1>, vector<128x128xf32>
    %c0_14 = arith.constant 0 : index
    %c0_15 = arith.constant 0 : index
    %41 = vector.load %arg5[%c0_14, %c0_15] : memref<128x128xf32, #tpu.memory_space<vmem>>, vector<128x128xf32>
    tpu.vector_store %arg5[%c0_14, %c0_15], %40 {strides = array<i32>} : memref<128x128xf32, #tpu.memory_space<vmem>>, vector<128x128xf32>,
    %42 = arith.truncf %40 : vector<128x128xf32> to vector<128x128xbf16>
    %c0_16 = arith.constant 0 : index
    %c0_17 = arith.constant 0 : index
    %43 = vector.load %arg6[%c0_16, %c0_17] : memref<128x128xbf16, #tpu.memory_space<vmem>>, vector<128x128xbf16>
    tpu.vector_store %arg6[%c0_16, %c0_17], %42 {strides = array<i32>} : memref<128x128xbf16, #tpu.memory_space<vmem>>, vector<128x128xbf16>,
    return
  }
  func.func @transform_0(%arg0: i32) -> (i32, i32) {
    %c0_i32 = arith.constant 0 : i32
    %c0_i32_0 = arith.constant 0 : i32
    return %arg0, %c0_i32 : i32, i32
  }
  func.func @transform_1(%arg0: i32) -> (i32, i32) {
    %c0_i32 = arith.constant 0 : i32
    %c0_i32_0 = arith.constant 0 : i32
    %c0_i32_1 = arith.constant 0 : i32
    return %c0_i32, %c0_i32_0 : i32, i32
  }
  func.func @transform_2(%arg0: i32) -> (i32, i32) {
    %c0_i32 = arith.constant 0 : i32
    %c0_i32_0 = arith.constant 0 : i32
    %c0_i32_1 = arith.constant 0 : i32
    return %c0_i32, %c0_i32_0 : i32, i32
  }
  func.func @transform_3(%arg0: i32) -> (i32, i32) {
    %c0_i32 = arith.constant 0 : i32
    %c0_i32_0 = arith.constant 0 : i32
    %c0_i32_1 = arith.constant 0 : i32
    return %c0_i32, %c0_i32_0 : i32, i32
  }
  func.func @transform_4(%arg0: i32) -> (i32, i32) {
    %c0_i32 = arith.constant 0 : i32
    %c0_i32_0 = arith.constant 0 : i32
    return %arg0, %c0_i32 : i32, i32
  }
  func.func @transform_5(%arg0: i32) -> (i32, i32) {
    %c0_i32 = arith.constant 0 : i32
    %c0_i32_0 = arith.constant 0 : i32
    return %arg0, %c0_i32 : i32, i32
  }
}

module attributes {stable_mosaic.version = 11 : i64} {
  func.func @kernel(%arg0: i32, %arg1: memref<4x128xbf16, #tpu.memory_space<vmem>>, %arg2: memref<1x128xf32, #tpu.memory_space<vmem>>, %arg3: memref<1x128xf32, #tpu.memory_space<vmem>>, %arg4: memref<128x128xbf16, #tpu.memory_space<vmem>>, %arg5: memref<128x128xbf16, #tpu.memory_space<vmem>>, %arg6: memref<1xf32, #tpu.memory_space<smem>>, %arg7: memref<4x128xf32, #tpu.memory_space<vmem>>, %arg8: memref<4x128xf32, #tpu.memory_space<vmem>>) attributes {dimension_semantics = [#tpu.dimension_semantics<parallel>], iteration_bounds = array<i64: 1>, scalar_prefetch = 0 : i64, scratch_operands = 0 : i64, tpu.core_type = #tpu.core_type<tc>, window_params = [{transform_indices = @transform_0, window_bounds = array<i64: 4, 128>}, {pipeline_mode = #tpu.pipeline_mode<synchronous>, transform_indices = @transform_1, window_bounds = array<i64: 1, 128>}, {pipeline_mode = #tpu.pipeline_mode<synchronous>, transform_indices = @transform_2, window_bounds = array<i64: 1, 128>}, {pipeline_mode = #tpu.pipeline_mode<synchronous>, transform_indices = @transform_3, window_bounds = array<i64: 128, 128>}, {pipeline_mode = #tpu.pipeline_mode<synchronous>, transform_indices = @transform_4, window_bounds = array<i64: 128, 128>}, {transform_indices = @transform_5, window_bounds = array<i64: 1>}, {transform_indices = @transform_6, window_bounds = array<i64: 4, 128>}, {transform_indices = @transform_7, window_bounds = array<i64: 4, 128>}]} {
    %c0 = arith.constant 0 : index
    %c0_0 = arith.constant 0 : index
    %0 = vector.load %arg1[%c0, %c0_0] : memref<4x128xbf16, #tpu.memory_space<vmem>>, vector<4x128xbf16>
    %1 = arith.extf %0 : vector<4x128xbf16> to vector<4x128xf32>
    %c0_1 = arith.constant 0 : index
    %c0_2 = arith.constant 0 : index
    %2 = vector.load %arg2[%c0_1, %c0_2] : memref<1x128xf32, #tpu.memory_space<vmem>>, vector<1x128xf32>
    %c0_3 = arith.constant 0 : index
    %c0_4 = arith.constant 0 : index
    %3 = vector.load %arg3[%c0_3, %c0_4] : memref<1x128xf32, #tpu.memory_space<vmem>>, vector<1x128xf32>
    %cst = arith.constant dense<0.000000e+00> : vector<4xf32>
    %4 = vector.multi_reduction <add>, %1, %cst [1] : vector<4x128xf32> to vector<4xf32>
    %5 = vector.shape_cast %4 : vector<4xf32> to vector<4x1xf32>
    %cst_5 = arith.constant 1.280000e+02 : f32
    %6 = vector.broadcast %cst_5 : f32 to vector<4x1xf32>
    %7 = arith.divf %5, %6 : vector<4x1xf32>
    %8 = vector.broadcast %7 : vector<4x1xf32> to vector<4x128xf32>
    %9 = arith.subf %1, %8 : vector<4x128xf32>
    %10 = arith.mulf %9, %9 : vector<4x128xf32>
    %cst_6 = arith.constant dense<0.000000e+00> : vector<4xf32>
    %11 = vector.multi_reduction <add>, %10, %cst_6 [1] : vector<4x128xf32> to vector<4xf32>
    %12 = vector.shape_cast %11 : vector<4xf32> to vector<4x1xf32>
    %cst_7 = arith.constant 1.280000e+02 : f32
    %13 = vector.broadcast %cst_7 : f32 to vector<4x1xf32>
    %14 = arith.divf %12, %13 : vector<4x1xf32>
    %cst_8 = arith.constant 9.99999974E-6 : f32
    %15 = vector.broadcast %cst_8 : f32 to vector<4x1xf32>
    %16 = arith.addf %14, %15 : vector<4x1xf32>
    %17 = math.rsqrt %16 : vector<4x1xf32>
    %18 = vector.broadcast %17 : vector<4x1xf32> to vector<4x128xf32>
    %19 = arith.mulf %9, %18 : vector<4x128xf32>
    %20 = vector.broadcast %2 : vector<1x128xf32> to vector<4x128xf32>
    %21 = arith.mulf %19, %20 : vector<4x128xf32>
    %22 = vector.broadcast %3 : vector<1x128xf32> to vector<4x128xf32>
    %23 = arith.addf %21, %22 : vector<4x128xf32>
    %24 = arith.truncf %23 : vector<4x128xf32> to vector<4x128xbf16>
    %c0_9 = arith.constant 0 : index
    %c0_10 = arith.constant 0 : index
    %25 = vector.load %arg4[%c0_9, %c0_10] : memref<128x128xbf16, #tpu.memory_space<vmem>>, vector<128x128xbf16>
    %cst_11 = arith.constant dense<0.000000e+00> : vector<4x128xf32>
    %26 = tpu.matmul %24, %25, %cst_11 {dimension_numbers = #tpu.dot_dimension_numbers<[1], [0], [0], [1], [0, 0, 1, 1], [], []>} : vector<4x128xbf16>, vector<128x128xbf16>, vector<4x128xf32> -> vector<4x128xf32>
    %27 = arith.mulf %26, %26 : vector<4x128xf32>
    %cst_12 = arith.constant dense<0.000000e+00> : vector<4xf32>
    %28 = vector.multi_reduction <add>, %27, %cst_12 [1] : vector<4x128xf32> to vector<4xf32>
    %29 = vector.shape_cast %28 : vector<4xf32> to vector<4x1xf32>
    %30 = math.rsqrt %29 : vector<4x1xf32>
    %31 = vector.broadcast %30 : vector<4x1xf32> to vector<4x128xf32>
    %32 = arith.mulf %26, %31 : vector<4x128xf32>
    %c0_13 = arith.constant 0 : index
    %c0_14 = arith.constant 0 : index
    %33 = vector.load %arg8[%c0_13, %c0_14] : memref<4x128xf32, #tpu.memory_space<vmem>>, vector<4x128xf32>
    tpu.vector_store %arg8[%c0_13, %c0_14], %32 {strides = array<i32>} : memref<4x128xf32, #tpu.memory_space<vmem>>, vector<4x128xf32>,
    %c0_15 = arith.constant 0 : index
    %34 = memref.load %arg6[%c0_15] : memref<1xf32, #tpu.memory_space<smem>>
    %35 = arith.truncf %32 : vector<4x128xf32> to vector<4x128xbf16>
    %c0_16 = arith.constant 0 : index
    %c0_17 = arith.constant 0 : index
    %36 = vector.load %arg5[%c0_16, %c0_17] : memref<128x128xbf16, #tpu.memory_space<vmem>>, vector<128x128xbf16>
    %cst_18 = arith.constant dense<0.000000e+00> : vector<4x128xf32>
    %37 = tpu.matmul %35, %36, %cst_18 {dimension_numbers = #tpu.dot_dimension_numbers<[1], [1], [0], [0], [0, 0, 1, 0], [], []>} : vector<4x128xbf16>, vector<128x128xbf16>, vector<4x128xf32> -> vector<4x128xf32>
    %38 = vector.broadcast %34 : f32 to vector<4x128xf32>
    %39 = arith.mulf %38, %37 : vector<4x128xf32>
    %c0_19 = arith.constant 0 : index
    %c0_20 = arith.constant 0 : index
    %40 = vector.load %arg7[%c0_19, %c0_20] : memref<4x128xf32, #tpu.memory_space<vmem>>, vector<4x128xf32>
    tpu.vector_store %arg7[%c0_19, %c0_20], %39 {strides = array<i32>} : memref<4x128xf32, #tpu.memory_space<vmem>>, vector<4x128xf32>,
    return
  }
  func.func @transform_0(%arg0: i32) -> (i32, i32) {
    %c0_i32 = arith.constant 0 : i32
    %c0_i32_0 = arith.constant 0 : i32
    return %arg0, %c0_i32 : i32, i32
  }
  func.func @transform_1(%arg0: i32) -> (i32, i32) {
    %c0_i32 = arith.constant 0 : i32
    %c0_i32_0 = arith.constant 0 : i32
    %c0_i32_1 = arith.constant 0 : i32
    return %c0_i32, %c0_i32_0 : i32, i32
  }
  func.func @transform_2(%arg0: i32) -> (i32, i32) {
    %c0_i32 = arith.constant 0 : i32
    %c0_i32_0 = arith.constant 0 : i32
    %c0_i32_1 = arith.constant 0 : i32
    return %c0_i32, %c0_i32_0 : i32, i32
  }
  func.func @transform_3(%arg0: i32) -> (i32, i32) {
    %c0_i32 = arith.constant 0 : i32
    %c0_i32_0 = arith.constant 0 : i32
    %c0_i32_1 = arith.constant 0 : i32
    return %c0_i32, %c0_i32_0 : i32, i32
  }
  func.func @transform_4(%arg0: i32) -> (i32, i32) {
    %c0_i32 = arith.constant 0 : i32
    %c0_i32_0 = arith.constant 0 : i32
    %c0_i32_1 = arith.constant 0 : i32
    return %c0_i32, %c0_i32_0 : i32, i32
  }
  func.func @transform_5(%arg0: i32) -> i32 {
    %c0_i32 = arith.constant 0 : i32
    %c0_i32_0 = arith.constant 0 : i32
    return %c0_i32 : i32
  }
  func.func @transform_6(%arg0: i32) -> (i32, i32) {
    %c0_i32 = arith.constant 0 : i32
    %c0_i32_0 = arith.constant 0 : i32
    return %arg0, %c0_i32 : i32, i32
  }
  func.func @transform_7(%arg0: i32) -> (i32, i32) {
    %c0_i32 = arith.constant 0 : i32
    %c0_i32_0 = arith.constant 0 : i32
    return %arg0, %c0_i32 : i32, i32
  }
}

</mosaic_0001>

<bundles_post_ra>
// kernel: new_clip_forward.4
= control target key start
LH: loop header
LB: loop body
LE: loop exit
PB: predicated region body
PF: predicated region fallthrough
CT: control target
= control target key end

     0   :  { %vm64_vm0 = vcmask 392192   ;;  %s245_s1 = inlined_call_operand.vmem [shape: bf16[48,128], index: 1, kind: input, shape index: {}]   ;;  %s246_s0 = inlined_call_operand.vmem [shape: bf16[64,48], index: 0, kind: input, shape index: {}]   ;;  %s247_s2 = inlined_call_operand.vmem [shape: bf16[64,128], index: 2, kind: output, shape index: {}]  }
   0x1   :  { %v164_v0 = vld [vmem:[%s245_s1 + $0x10] sm:$0xff]  ;;  %v163_v1 = vld [vmem:[%s245_s1 + $0x8] sm:$0xff]  ;;  %v162_v2 = vld [vmem:[%s245_s1] sm:$0xff] }
   0x2   :  { %82 = vmatpush.bf16.msra.mxu0 %v164_v0  ;;  %188 = vmatpush.bf16.msra.mxu1 %v164_v0  ;;  %v158_v3 = vld [vmem:[%s246_s0] sm:$0xff]  ;;  %v159_v4 = vld [vmem:[%s246_s0 + $0x8] sm:$0xff]  ;;  %v160_v5 = vld [vmem:[%s246_s0 + $0x10] sm:$0xff] }
   0x3   :  { %189 = vmatpush.bf16.msra.mxu2 %v164_v0  ;;  %190 = vmatpush.bf16.msra.mxu3 %v164_v0  ;;  %v161_v6 = vld [vmem:[%s246_s0 + $0x18] sm:$0xff] }
   0x6   :  { %83 = vmatpush.bf16.msra.mxu0 %v163_v1  ;;  %191 = vmatpush.bf16.msra.mxu1 %v163_v1 }
   0x7   :  { %192 = vmatpush.bf16.msra.mxu2 %v163_v1  ;;  %193 = vmatpush.bf16.msra.mxu3 %v163_v1 }
   0xa   :  { %84 = vmatpush.bf16.msra.mxu0 %v162_v2  ;;  %194 = vmatpush.bf16.msra.mxu1 %v162_v2 }
   0xb   :  { %195 = vmatpush.bf16.msra.mxu2 %v162_v2  ;;  %196 = vmatpush.bf16.msra.mxu3 %v162_v2 }
   0xd   :  { %154 = vmatmul.msk.bf16.vlgmr.msra.gmra.mxu0 %vm64_vm0, %v158_v3  ;;  %155 = vmatmul.msk.bf16.vlgmr.msra.gmra.mxu1 %vm64_vm0, %v159_v4 }
   0xe   :  { %156 = vmatmul.msk.bf16.vlgmr.msra.gmra.mxu2 %vm64_vm0, %v160_v5  ;;  %157 = vmatmul.msk.bf16.vlgmr.msra.gmra.mxu3 %vm64_vm0, %v161_v6 }
  0x8a   :  { %v86_v7 = vpop.f32.mrf.mxu0  ;;  %v91_v8 = vpop.f32.mrf.mxu1 }
  0x91   :  { %v96_v9 = vpop.f32.mrf.mxu2  ;;  %v101_v10 = vpop.f32.mrf.mxu3 }
  0x92   :  { %v88_v11 = vpop.f32.mrf.mxu0  ;;  %v93_v12 = vpop.f32.mrf.mxu1 }
  0x93   :  { %v168_v13 = vpack.c.bf16 %v88_v11, %v86_v7  ;;  %v173_v14 = vpack.c.bf16 %v93_v12, %v91_v8 }
  0x95   :  { %169 = vst [vmem:[%s247_s2] sm:$0xff] %v168_v13  }
  0x96   :  { %185 = vst [vmem:[%s247_s2 + $0x8] sm:$0xff] %v173_v14  }
  0x99   :  { %v98_v15 = vpop.f32.mrf.mxu2  ;;  %v103_v16 = vpop.f32.mrf.mxu3 }
  0x9a   :  { %v178_v17 = vpack.c.bf16 %v98_v15, %v96_v9  ;;  %v183_v18 = vpack.c.bf16 %v103_v16, %v101_v10 }
  0x9c   :  { %186 = vst [vmem:[%s247_s2 + $0x10] sm:$0xff] %v178_v17  }
  0x9d   :  { %187 = vst [vmem:[%s247_s2 + $0x18] sm:$0xff] %v183_v18  }

// kernel: new_clip_forward.5
= control target key start
LH: loop header
LB: loop body
LE: loop exit
PB: predicated region body
PF: predicated region fallthrough
CT: control target
= control target key end

     0   :  { %s682_s0 = inlined_call_operand.vmem [shape: bf16[4,16,128], index: 0, kind: input, shape index: {}]   ;;  %s683_s1 = inlined_call_operand.vmem [shape: bf16[1,128], index: 1, kind: input, shape index: {}]   ;;  %s684_s2 = inlined_call_operand.vmem [shape: bf16[1,128], index: 2, kind: input, shape index: {}]   ;;  %s685_s3 = inlined_call_operand.vmem [shape: bf16[16,128], index: 3, kind: input, shape index: {}]   ;;  %s686_s4 = inlined_call_operand.vmem [shape: f32[1,128], index: 4, kind: input, shape index: {}]   ;;  %s687_s5 = inlined_call_operand.vmem [shape: f32[1,128], index: 5, kind: input, shape index: {}]   ;;  %s688_s6 = inlined_call_operand.hbm [shape: bf16[4,16,128], index: 6, kind: output, shape index: {0}]   ;;  %s689_s7 = inlined_call_operand.vmem [shape: bf16[4,128], index: 7, kind: output, shape index: {1}]  }
   0x1   :  { %v356_v0 = vld [vmem:[%s682_s0 + $0x8] sm:$0xff]   ;;  %v333_v1 = vld [vmem:[%s685_s3] sm:$0xff]   ;;  %v357_v10 = vld [vmem:[%s682_s0 + $0x10] sm:$0xff]  }
   0x2   :  { %v317_v2 = vld [vmem:[%s682_s0] sm:$0xff]   ;;  %v323_v3 = vunpack.c.h.bf16 %v356_v0  ;;  %v335_v4 = vunpack.c.h.bf16 %v333_v1 }
   0x3   :  { %v319_v5 = vunpack.c.h.bf16 %v317_v2  ;;  %v261_v6 = vld [vmem:[%s683_s1] sm:$0x1] }
   0x4   :  { %v263_v7 = vld [vmem:[%s684_s2] sm:$0x1]  ;;  %v262_v8 = vunpack.c.l.bf16 %v261_v6 }
   0x5   :  { %v264_v9 = vunpack.c.l.bf16 %v263_v7 }
   0x6   :  { %13 = vsyncpa [#allocation3], 0  ;;  %v476_v11 = vadd.f32 %v335_v4, %v323_v3  ;;  %v49_v12 = vadd.f32 %v335_v4, %v319_v5  ;;  %vm266_vm0 = vcmask 1040384   ;;  %v326_v14 = vunpack.c.l.bf16 %v357_v10  ;;  %v358_v21 = vld [vmem:[%s682_s0 + $0x18] sm:$0xff]   ;;  %s415_s19 = smov [#allocation2]   ;;  %s300_s23 = sshll.u32 %s688_s6, 4  ;;  %s301_s23 = int_to_ptr.hbm [resolvable:$true] %s300_s23 }
   0x7   :  { %v265_v13 = vadd.f32 %v264_v9, %v262_v8  ;;  %v334_v15 = vunpack.c.l.bf16 %v333_v1  ;;  %v322_v16 = vunpack.c.l.bf16 %v356_v0  ;;  %v318_v18 = vunpack.c.l.bf16 %v317_v2  ;;  %s298_s20 = sshll.u32 %s415_s19, 4  ;;  %s417_s24 = smov 4   ;;  %s299_s20 = int_to_ptr.vmem [resolvable:$true] %s298_s20 }
   0x8   :  { %62 = vadd.xlane.f32.xlu2 %v476_v11  ;;  %58 = vadd.xlane.f32.xlu1 %v49_v12  ;;  %v331_v23 = vunpack.c.h.bf16 %v358_v21  ;;  %v330_v24 = vunpack.c.l.bf16 %v358_v21  ;;  %v327_v25 = vunpack.c.h.bf16 %v357_v10  ;;  %v414_v29 = vmov 128.0  }
   0x9   :  { %v267_v17 = vsel %vm266_vm0, %v265_v13, 0.0  ;;  %v52_v19 = vadd.f32 %v334_v15, %v326_v14  ;;  %v50_v20 = vadd.f32 %v334_v15, %v322_v16  ;;  %v48_v22 = vadd.f32 %v334_v15, %v318_v18 }
   0xa   :  { %268 = vadd.xlane.f32.xlu0 %v267_v17  ;;  %v55_v26 = vadd.f32 %v335_v4, %v331_v23  ;;  %v54_v27 = vadd.f32 %v334_v15, %v330_v24  ;;  %v53_v28 = vadd.f32 %v335_v4, %v327_v25  ;;  %368 = vrcp.f32 %v414_v29 }
  0x10   :  { %64 = vadd.xlane.f32.xlu2 %v52_v19  ;;  %60 = vadd.xlane.f32.xlu1 %v50_v20  ;;  %v369_v30 = vpop.eup %368 }
  0x11   :  { %v73_v31 = vmul.f32 128.0, %v369_v30  ;;  %vm77_vm1 = vweird.f32 %v369_v30 }
  0x12   :  { %56 = vadd.xlane.f32.xlu0 %v48_v22 }
  0x13   :  { %v74_v32 = vsub.f32 1.0, %v73_v31 }
  0x15   :  { %v75_v33 = vmul.f32 %v369_v30, %v74_v32 }
  0x17   :  { %v76_v34 = vadd.f32 %v369_v30, %v75_v33 }
  0x18   :  { %70 = vadd.xlane.f32.xlu2 %v55_v26  ;;  %68 = vadd.xlane.f32.xlu1 %v54_v27 }
  0x19   :  { %v483_v35 = vsel %vm77_vm1, %v369_v30, %v76_v34 }
  0x1a   :  { %66 = vadd.xlane.f32.xlu0 %v53_v28 }
  0x7b   :  { %v63_v36 = vpop.xlane.xlu2 %62  ;;  %v59_v37 = vpop.xlane.xlu1 %58 }
  0x7c   :  { %v80_v38 = vmul.f32 %v483_v35, %v59_v37  ;;  %v82_v55 = vmul.f32 %v483_v35, %v63_v36 }
  0x7d   :  { %v269_v39 = vpop.xlane.xlu0 %268 }
  0x7e   :  { %v486_v40 = vsub.f32 %v49_v12, %v80_v38  ;;  %v270_v46 = vmul.f32 %v269_v39, %v483_v35  ;;  %v513_v62 = vsub.f32 %v476_v11, %v82_v55 }
  0x80   :  { %v96_v41 = vmul.f32 %v486_v40, %v486_v40  ;;  %v504_v54 = vsub.f32 %v265_v13, %v270_v46  ;;  %v98_v4 = vmul.f32 %v513_v62, %v513_v62 }
  0x82   :  { %105 = vadd.xlane.f32.xlu2 %v96_v41  ;;  %v272_v59 = vmul.f32 %v504_v54, %v504_v54 }
  0x83   :  { %v65_v42 = vpop.xlane.xlu2 %64  ;;  %v61_v43 = vpop.xlane.xlu1 %60 }
  0x84   :  { %v83_v44 = vmul.f32 %v483_v35, %v65_v42  ;;  %v81_v45 = vmul.f32 %v483_v35, %v61_v43  ;;  %v273_v3 = vsel %vm266_vm0, %v272_v59, 0.0 }
  0x85   :  { %v57_v47 = vpop.xlane.xlu0 %56 }
  0x86   :  { %v493_v48 = vsub.f32 %v52_v19, %v83_v44  ;;  %v495_v49 = vsub.f32 %v50_v20, %v81_v45  ;;  %v79_v50 = vmul.f32 %v483_v35, %v57_v47 }
  0x88   :  { %v498_v51 = vsub.f32 %v48_v22, %v79_v50  ;;  %v99_v52 = vmul.f32 %v493_v48, %v493_v48  ;;  %v97_v53 = vmul.f32 %v495_v49, %v495_v49 }
  0x8a   :  { %111 = vadd.xlane.f32.xlu2 %v99_v52  ;;  %107 = vadd.xlane.f32.xlu0 %v97_v53  ;;  %v95_v56 = vmul.f32 %v498_v51, %v498_v51 }
  0x8b   :  { %v71_v57 = vpop.xlane.xlu2 %70  ;;  %v69_v61 = vpop.xlane.xlu1 %68 }
  0x8c   :  { %v86_v58 = vmul.f32 %v483_v35, %v71_v57  ;;  %103 = vadd.xlane.f32.xlu1 %v95_v56  ;;  %v85_v2 = vmul.f32 %v483_v35, %v69_v61 }
  0x8d   :  { %v67_v60 = vpop.xlane.xlu0 %66 }
  0x8e   :  { %v515_v63 = vsub.f32 %v55_v26, %v86_v58  ;;  %v84_v0 = vmul.f32 %v483_v35, %v67_v60  ;;  %v526_v6 = vsub.f32 %v54_v27, %v85_v2 }
  0x90   :  { %v102_v1 = vmul.f32 %v515_v63, %v515_v63  ;;  %v524_v5 = vsub.f32 %v53_v28, %v84_v0  ;;  %v101_v8 = vmul.f32 %v526_v6, %v526_v6 }
  0x92   :  { %117 = vadd.xlane.f32.xlu2 %v102_v1  ;;  %274 = vadd.xlane.f32.xlu0 %v273_v3  ;;  %v100_v7 = vmul.f32 %v524_v5, %v524_v5 }
  0x94   :  { %109 = vadd.xlane.f32.xlu1 %v98_v4 }
  0x9a   :  { %113 = vadd.xlane.f32.xlu0 %v100_v7  ;;  %v582_v7 = vld [vmem:[%s686_s4] ss:$0 sm:$0xff] }
  0x9c   :  { %115 = vadd.xlane.f32.xlu1 %v101_v8 }
  0xf5   :  { %v106_v9 = vpop.xlane.xlu2 %105 }
  0xf6   :  { %v120_v10 = vmul.f32 %v106_v9, %v483_v35 }
  0xf8   :  { %v128_v11 = vadd.f32 1e-05, %v120_v10 }
  0xfa   :  { %370 = vrsqrt.f32 %v128_v11  ;;  %vm151_vm3 = vweird.f32 %v128_v11 }
  0xfd   :  { %v112_v12 = vpop.xlane.xlu2 %111  ;;  %v108_v13 = vpop.xlane.xlu0 %107 }
  0xfe   :  { %v123_v14 = vmul.f32 %v112_v12, %v483_v35  ;;  %v121_v15 = vmul.f32 %v108_v13, %v483_v35 }
  0xff   :  { %v104_v16 = vpop.xlane.xlu1 %103 }
 0x100   :  { %v371_v17 = vpop.eup %370  ;;  %v535_v18 = vadd.f32 1e-05, %v123_v14  ;;  %v537_v19 = vadd.f32 1e-05, %v121_v15  ;;  %v119_v20 = vmul.f32 %v104_v16, %v483_v35 }
 0x101   :  { %v146_v21 = vmul.f32 %v371_v17, %v128_v11  ;;  %vm152_vm2 = vweird.f32 %v371_v17 }
 0x102   :  { %372 = vrsqrt.f32 %v535_v18  ;;  %v127_v22 = vadd.f32 1e-05, %v119_v20  ;;  %vm563_vm4 = vmor %vm151_vm3, %vm152_vm2  ;;  %vm181_vm7 = vweird.f32 %v535_v18  ;;  %vm161_vm10 = vweird.f32 %v537_v19 }
 0x103   :  { %v147_v23 = vmul.f32 %v371_v17, %v146_v21  ;;  %374 = vrsqrt.f32 %v537_v19 }
 0x104   :  { %376 = vrsqrt.f32 %v127_v22  ;;  %vm141_vm6 = vweird.f32 %v127_v22 }
 0x105   :  { %v148_v24 = vmul.f32 0.5, %v147_v23  ;;  %v118_v25 = vpop.xlane.xlu2 %117  ;;  %v275_v26 = vpop.xlane.xlu0 %274 }
 0x106   :  { %v126_v27 = vmul.f32 %v118_v25, %v483_v35  ;;  %v276_v28 = vmul.f32 %v275_v26, %v483_v35 }
 0x107   :  { %v149_v29 = vsub.f32 1.5, %v148_v24  ;;  %v110_v30 = vpop.xlane.xlu1 %109 }
 0x108   :  { %v544_v31 = vpop.eup %372  ;;  %v546_v32 = vadd.f32 1e-05, %v126_v27  ;;  %v548_v33 = vadd.f32 1e-05, %v276_v28  ;;  %v122_v37 = vmul.f32 %v110_v30, %v483_v35 }
 0x109   :  { %v550_v34 = vpop.eup %374  ;;  %v176_v36 = vmul.f32 %v544_v31, %v535_v18  ;;  %v150_v41 = vmul.f32 %v371_v17, %v149_v29  ;;  %vm182_vm11 = vweird.f32 %v544_v31  ;;  %v26_v18 = vld [vmem:[%s686_s4] sm:$0x1] }
 0x10a   :  { %v377_v38 = vpop.eup %376  ;;  %v156_v39 = vmul.f32 %v550_v34, %v537_v19  ;;  %378 = vrsqrt.f32 %v546_v32  ;;  %v561_v46 = vadd.f32 1e-05, %v122_v37  ;;  %vm162_vm8 = vweird.f32 %v550_v34  ;;  %vm624_vm1 = vmor %vm181_vm7, %vm182_vm11 }
 0x10b   :  { %v136_v42 = vmul.f32 %v377_v38, %v127_v22  ;;  %v177_v43 = vmul.f32 %v544_v31, %v176_v36  ;;  %380 = vrsqrt.f32 %v548_v33  ;;  %v154_v55 = vsel %vm563_vm4, %v371_v17, %v150_v41  ;;  %v597_v17 = vld [vmem:[%s687_s5] ss:$0 sm:$0xff]  ;;  %vm607_vm13 = vmor %vm161_vm10, %vm162_vm8 }
 0x10c   :  { %v157_v44 = vmul.f32 %v550_v34, %v156_v39  ;;  %382 = vrsqrt.f32 %v561_v46  ;;  %vm142_vm5 = vweird.f32 %v377_v38  ;;  %v216_v4 = vmul.f32 %v154_v55, %v486_v40 }
 0x10d   :  { %v137_v45 = vmul.f32 %v377_v38, %v136_v42  ;;  %v114_v47 = vpop.xlane.xlu0 %113  ;;  %v178_v59 = vmul.f32 0.5, %v177_v43  ;;  %vm143_vm9 = vmor %vm141_vm6, %vm142_vm5  ;;  %vm211_vm12 = vweird.f32 %v546_v32  ;;  %vm284_vm14 = vweird.f32 %v548_v33 }
 0x10e   :  { %v158_v52 = vmul.f32 0.5, %v157_v44  ;;  %v124_v53 = vmul.f32 %v114_v47, %v483_v35  ;;  %v227_v16 = vmul.f32 %v582_v7, %v216_v4  ;;  %vm171_vm5 = vweird.f32 %v561_v46 }
 0x10f   :  { %v138_v56 = vmul.f32 0.5, %v137_v45  ;;  %v116_v57 = vpop.xlane.xlu1 %115  ;;  %v179_v11 = vsub.f32 1.5, %v178_v59 }
 0x110   :  { %v571_v58 = vpop.eup %378  ;;  %v573_v60 = vadd.f32 1e-05, %v124_v53  ;;  %v125_v61 = vmul.f32 %v116_v57, %v483_v35  ;;  %v159_v0 = vsub.f32 1.5, %v158_v52  ;;  %v238_v36 = vadd.f32 %v597_v17, %v227_v16 }
 0x111   :  { %v139_v1 = vsub.f32 1.5, %v138_v56  ;;  %v206_v2 = vmul.f32 %v571_v58, %v546_v32  ;;  %v381_v3 = vpop.eup %380  ;;  %v180_v25 = vmul.f32 %v544_v31, %v179_v11  ;;  %vm212_vm0 = vweird.f32 %v571_v58 }
 0x112   :  { %384 = vrsqrt.f32 %v573_v60  ;;  %v585_v8 = vadd.f32 1e-05, %v125_v61  ;;  %v279_v10 = vmul.f32 %v381_v3, %v548_v33  ;;  %v383_v40 = vpop.eup %382  ;;  %v160_v12 = vmul.f32 %v550_v34, %v159_v0  ;;  %vm643_vm4 = vmor %vm211_vm12, %vm212_vm0 }
 0x113   :  { %v140_v9 = vmul.f32 %v377_v38, %v139_v1  ;;  %v207_v35 = vmul.f32 %v571_v58, %v206_v2  ;;  %v166_v21 = vmul.f32 %v383_v40, %v561_v46  ;;  %vm285_vm15 = vweird.f32 %v381_v3 }
 0x114   :  { %386 = vrsqrt.f32 %v585_v8  ;;  %v280_v15 = vmul.f32 %v381_v3, %v279_v10  ;;  %v164_v27 = vsel %vm607_vm13, %v550_v34, %v160_v12  ;;  %vm286_vm2 = vmor %vm284_vm14, %vm285_vm15  ;;  %vm172_vm3 = vweird.f32 %v383_v40 }
 0x115   :  { %v144_v13 = vsel %vm143_vm9, %v377_v38, %v140_v9  ;;  %v208_v14 = vmul.f32 0.5, %v207_v35  ;;  %v217_v44 = vmul.f32 %v164_v27, %v495_v49  ;;  %v184_v50 = vsel %vm624_vm1, %v544_v31, %v180_v25  ;;  %v27_v31 = vld [vmem:[%s687_s5] sm:$0x1]  ;;  %vm173_vm7 = vmor %vm171_vm5, %vm172_vm3 }
 0x116   :  { %v215_v20 = vmul.f32 %v144_v13, %v498_v51  ;;  %v281_v23 = vmul.f32 0.5, %v280_v15  ;;  %v167_v51 = vmul.f32 %v383_v40, %v166_v21  ;;  %vm191_vm6 = vweird.f32 %v573_v60 }
 0x117   :  { %v209_v22 = vsub.f32 1.5, %v208_v14  ;;  %v219_v61 = vmul.f32 %v184_v50, %v493_v48  ;;  %vm201_vm11 = vweird.f32 %v585_v8 }
 0x118   :  { %v385_v24 = vpop.eup %384  ;;  %v226_v19 = vmul.f32 %v582_v7, %v215_v20  ;;  %v282_v28 = vsub.f32 1.5, %v281_v23  ;;  %v168_v38 = vmul.f32 0.5, %v167_v51 }
 0x119   :  { %v186_v29 = vmul.f32 %v385_v24, %v573_v60  ;;  %v210_v34 = vmul.f32 %v571_v58, %v209_v22  ;;  %vm192_vm8 = vweird.f32 %v385_v24  ;;  %v230_v48 = vmul.f32 %v582_v7, %v219_v61 }
 0x11a   :  { %v387_v30 = vpop.eup %386  ;;  %v237_v37 = vadd.f32 %v597_v17, %v226_v19  ;;  %v283_v41 = vmul.f32 %v381_v3, %v282_v28  ;;  %v169_v47 = vsub.f32 1.5, %v168_v38  ;;  %vm193_vm10 = vmor %vm191_vm6, %vm192_vm8 }
 0x11b   :  { %v187_v42 = vmul.f32 %v385_v24, %v186_v29  ;;  %v196_v43 = vmul.f32 %v387_v30, %v585_v8  ;;  %v214_v57 = vsel %vm643_vm4, %v571_v58, %v210_v34  ;;  %vm202_vm9 = vweird.f32 %v387_v30 }
 0x11c   :  { %v339_v45 = vpack.c.bf16 %v238_v36, %v237_v37  ;;  %v287_v52 = vsel %vm286_vm2, %v381_v3, %v283_v41  ;;  %v170_v56 = vmul.f32 %v383_v40, %v169_v47  ;;  %v222_v4 = vmul.f32 %v214_v57, %v515_v63  ;;  %vm203_vm12 = vmor %vm201_vm11, %vm202_vm9 }
 0x11d   :  { %v188_v53 = vmul.f32 0.5, %v187_v42  ;;  %v197_v55 = vmul.f32 %v387_v30, %v196_v43  ;;  %v288_v33 = vmul.f32 %v287_v52, %v504_v54  ;;  %v228_v54 = vmul.f32 %v582_v7, %v217_v44 }
 0x11e   :  { %340 = vst [vmem:[#allocation2] sm:$0xff] %v339_v45   ;;  %v174_v46 = vsel %vm173_vm7, %v383_v40, %v170_v56  ;;  %v233_v60 = vmul.f32 %v582_v7, %v222_v4  ;;  %v241_v8 = vadd.f32 %v597_v17, %v230_v48 }
 0x11f   :  { %v189_v32 = vsub.f32 1.5, %v188_v53  ;;  %v198_v59 = vmul.f32 0.5, %v197_v55  ;;  %v289_v0 = vmul.f32 %v288_v33, %v26_v18  ;;  %v218_v1 = vmul.f32 %v174_v46, %v513_v62 }
 0x120   :  { %v239_v40 = vadd.f32 %v597_v17, %v228_v54 }
 0x121   :  { %v190_v2 = vmul.f32 %v385_v24, %v189_v32  ;;  %v199_v3 = vsub.f32 1.5, %v198_v59  ;;  %v290_v9 = vadd.f32 %v289_v0, %v27_v31  ;;  %v229_v58 = vmul.f32 %v582_v7, %v218_v1 }
 0x123   :  { %v194_v35 = vsel %vm193_vm10, %v385_v24, %v190_v2  ;;  %v200_v10 = vmul.f32 %v387_v30, %v199_v3  ;;  %v291_v11 = vperm.slane %v290_v9, 0  ;;  %v240_v63 = vadd.f32 %v597_v17, %v229_v58 }
 0x124   :  { %v220_v62 = vmul.f32 %v194_v35, %v524_v5 }
 0x125   :  { %v204_v12 = vsel %vm203_vm12, %v387_v30, %v200_v10  ;;  %v292_v13 = vpack.c.bf16 %v291_v11, %v291_v11  ;;  %v344_v16 = vpack.c.bf16 %v240_v63, %v239_v40 }
 0x126   :  { %v231_v14 = vmul.f32 %v582_v7, %v220_v62  ;;  %v221_v15 = vmul.f32 %v204_v12, %v526_v6  ;;  %v244_v6 = vadd.f32 %v597_v17, %v233_v60 }
 0x127   :  { %293 = vst [vmem:[%s689_s7] sm:$0x3] %v292_v13  ;;  %s416_s7 = smov 64  }
 0x128   :  { %v242_v5 = vadd.f32 %v597_v17, %v231_v14  ;;  %v232_v20 = vmul.f32 %v582_v7, %v221_v15  ;;  %359 = vst [vmem:[#allocation2 + $0x8] sm:$0xff] %v344_v16  }
 0x12a   :  { %v349_v21 = vpack.c.bf16 %v242_v5, %v241_v8  ;;  %v243_v22 = vadd.f32 %v597_v17, %v232_v20 }
 0x12c   :  { %360 = vst [vmem:[#allocation2 + $0x10] sm:$0xff] %v349_v21   ;;  %v354_v23 = vpack.c.bf16 %v244_v6, %v243_v22 }
 0x12e   :  { %361 = vst [vmem:[#allocation2 + $0x18] sm:$0xff] %v354_v23  }
 0x12f   :  { %306 = dma.vmem_to_hbm [thread:$0]  %s299_s20, 512, %s301_s23, [#allocation3], %s416_s7, %s416_s7, %s417_s24  }
 0x130   :  { %412 = dma.done.wait [#allocation3], 512  }
 0x131   :  { %413 = vsyncadd [#allocation3], 4294966784 }
 0x132   :  { %315 = vsyncpa [#allocation3], 1 }

// kernel: new_clip_forward.6
= control target key start
LH: loop header
LB: loop body
LE: loop exit
PB: predicated region body
PF: predicated region fallthrough
CT: control target
= control target key end

     0   :  { %v1077_v19 = vmov 128.0   ;;  %s1574_s0 = inlined_call_operand.vmem [shape: bf16[128,128], index: 0, kind: input, shape index: {}]   ;;  %s1575_s1 = inlined_call_operand.vmem [shape: f32[1,128], index: 1, kind: input, shape index: {}]   ;;  %s1576_s2 = inlined_call_operand.vmem [shape: f32[1,128], index: 2, kind: input, shape index: {}]   ;;  %s1577_s3 = inlined_call_operand.vmem [shape: bf16[128,128], index: 3, kind: input, shape index: {}]   ;;  %s1578_s4 = inlined_call_operand.vmem [shape: f32[128,128], index: 4, kind: output, shape index: {0}]   ;;  %s1579_s5 = inlined_call_operand.vmem [shape: bf16[128,128], index: 5, kind: output, shape index: {1}]  }
   0x1   :  { %v1113_v0 = vld [vmem:[%s1574_s0 + $0x20] sm:$0xff]   ;;  %v1121_v2 = vld [vmem:[%s1574_s0 + $0x30] sm:$0xff]   ;;  %v1141_v10 = vld [vmem:[%s1574_s0 + $0x28] sm:$0xff]   ;;  %1041 = vrcp.f32 %v1077_v19 }
   0x2   :  { %v927_v1 = vld [vmem:[%s1574_s0] sm:$0xff]   ;;  %v944_v3 = vunpack.c.l.bf16 %v1113_v0  ;;  %v952_v5 = vunpack.c.l.bf16 %v1121_v2  ;;  %v945_v6 = vunpack.c.h.bf16 %v1113_v0  ;;  %v953_v8 = vunpack.c.h.bf16 %v1121_v2  ;;  %v1136_v9 = vld [vmem:[%s1574_s0 + $0x10] sm:$0xff]   ;;  %v1154_v15 = vld [vmem:[%s1574_s0 + $0x38] sm:$0xff]  }
   0x3   :  { %v928_v4 = vunpack.c.l.bf16 %v927_v1  ;;  %v929_v7 = vunpack.c.h.bf16 %v927_v1  ;;  %v936_v11 = vunpack.c.l.bf16 %v1136_v9  ;;  %v937_v12 = vunpack.c.h.bf16 %v1136_v9  ;;  %v1162_v17 = vld [vmem:[%s1574_s0 + $0x18] sm:$0xff]   ;;  %v1177_v34 = vld [vmem:[%s1574_s0 + $0x8] sm:$0xff]   ;;  %v924_v19 = vld [vmem:[%s1577_s3 + $0x30] sm:$0xff] }
   0x4   :  { %69 = vadd.xlane.f32.xlu1 %v944_v3  ;;  %77 = vadd.xlane.f32.xlu2 %v952_v5  ;;  %v949_v13 = vunpack.c.h.bf16 %v1141_v10  ;;  %v948_v14 = vunpack.c.l.bf16 %v1141_v10  ;;  %v957_v16 = vunpack.c.h.bf16 %v1154_v15  ;;  %v940_v18 = vunpack.c.l.bf16 %v1162_v17 }
   0x5   :  { %53 = vadd.xlane.f32.xlu0 %v928_v4  ;;  %v932_v40 = vunpack.c.l.bf16 %v1177_v34  ;;  %v941_v48 = vunpack.c.h.bf16 %v1162_v17  ;;  %v956_v50 = vunpack.c.l.bf16 %v1154_v15  ;;  %v933_v59 = vunpack.c.h.bf16 %v1177_v34 }
   0x7   :  { %v1042_v20 = vpop.eup %1041 }
   0x8   :  { %v86_v21 = vmul.f32 128.0, %v1042_v20  ;;  %vm90_vm0 = vweird.f32 %v1042_v20 }
   0xa   :  { %v87_v22 = vsub.f32 1.0, %v86_v21  ;;  %v921_v21 = vld [vmem:[%s1577_s3 + $0x18] sm:$0xff] }
   0xc   :  { %71 = vadd.xlane.f32.xlu1 %v945_v6  ;;  %79 = vadd.xlane.f32.xlu2 %v953_v8  ;;  %v88_v23 = vmul.f32 %v1042_v20, %v87_v22  ;;  %v920_v22 = vld [vmem:[%s1577_s3 + $0x10] sm:$0xff] }
   0xd   :  { %55 = vadd.xlane.f32.xlu0 %v929_v7 }
   0xe   :  { %v89_v24 = vadd.f32 %v1042_v20, %v88_v23  ;;  %v919_v23 = vld [vmem:[%s1577_s3 + $0x8] sm:$0xff] }
  0x10   :  { %v1167_v25 = vsel %vm90_vm0, %v1042_v20, %v89_v24  ;;  %v922_v20 = vld [vmem:[%s1577_s3 + $0x20] sm:$0xff] }
  0x14   :  { %63 = vadd.xlane.f32.xlu1 %v937_v12  ;;  %75 = vadd.xlane.f32.xlu2 %v949_v13 }
  0x15   :  { %61 = vadd.xlane.f32.xlu0 %v936_v11 }
  0x1c   :  { %73 = vadd.xlane.f32.xlu1 %v948_v14 }
  0x24   :  { %83 = vadd.xlane.f32.xlu1 %v957_v16 }
  0x2c   :  { %65 = vadd.xlane.f32.xlu1 %v940_v18 }
  0x77   :  { %v70_v26 = vpop.xlane.xlu1 %69  ;;  %v78_v29 = vpop.xlane.xlu2 %77 }
  0x78   :  { %v54_v27 = vpop.xlane.xlu0 %53  ;;  %v104_v46 = vmul.f32 %v1167_v25, %v78_v29  ;;  %v100_v58 = vmul.f32 %v1167_v25, %v70_v26 }
  0x79   :  { %v92_v28 = vmul.f32 %v1167_v25, %v54_v27 }
  0x7a   :  { %v1203_v52 = vsub.f32 %v952_v5, %v104_v46  ;;  %v1224_v61 = vsub.f32 %v944_v3, %v100_v58 }
  0x7b   :  { %v1170_v30 = vsub.f32 %v928_v4, %v92_v28  ;;  %v918_v28 = vld [vmem:[%s1577_s3] sm:$0xff] }
  0x7c   :  { %v136_v55 = vmul.f32 %v1203_v52, %v1203_v52  ;;  %v132_v1 = vmul.f32 %v1224_v61, %v1224_v61 }
  0x7d   :  { %v124_v31 = vmul.f32 %v1170_v30, %v1170_v30 }
  0x7f   :  { %140 = vadd.xlane.f32.xlu2 %v124_v31  ;;  %v72_v32 = vpop.xlane.xlu1 %71  ;;  %v80_v37 = vpop.xlane.xlu2 %79 }
  0x80   :  { %v56_v33 = vpop.xlane.xlu0 %55  ;;  %v101_v35 = vmul.f32 %v1167_v25, %v72_v32  ;;  %v105_v63 = vmul.f32 %v1167_v25, %v80_v37 }
  0x81   :  { %v93_v36 = vmul.f32 %v1167_v25, %v56_v33 }
  0x82   :  { %v1181_v38 = vsub.f32 %v945_v6, %v101_v35  ;;  %v1235_v5 = vsub.f32 %v953_v8, %v105_v63 }
  0x83   :  { %v1183_v39 = vsub.f32 %v929_v7, %v93_v36 }
  0x84   :  { %v133_v41 = vmul.f32 %v1181_v38, %v1181_v38  ;;  %v137_v0 = vmul.f32 %v1235_v5, %v1235_v5 }
  0x85   :  { %v125_v42 = vmul.f32 %v1183_v39, %v1183_v39 }
  0x86   :  { %158 = vadd.xlane.f32.xlu1 %v133_v41 }
  0x87   :  { %57 = vadd.xlane.f32.xlu2 %v932_v40  ;;  %142 = vadd.xlane.f32.xlu0 %v125_v42  ;;  %v76_v45 = vpop.xlane.xlu2 %75  ;;  %v64_v54 = vpop.xlane.xlu1 %63 }
  0x88   :  { %v62_v43 = vpop.xlane.xlu0 %61  ;;  %v103_v49 = vmul.f32 %v1167_v25, %v76_v45  ;;  %v97_v57 = vmul.f32 %v1167_v25, %v64_v54 }
  0x89   :  { %v96_v44 = vmul.f32 %v1167_v25, %v62_v43 }
  0x8a   :  { %v1207_v53 = vsub.f32 %v949_v13, %v103_v49  ;;  %v1220_v60 = vsub.f32 %v937_v12, %v97_v57 }
  0x8b   :  { %v1194_v47 = vsub.f32 %v936_v11, %v96_v44 }
  0x8c   :  { %v135_v56 = vmul.f32 %v1207_v53, %v1207_v53  ;;  %v129_v62 = vmul.f32 %v1220_v60, %v1220_v60 }
  0x8d   :  { %v128_v51 = vmul.f32 %v1194_v47, %v1194_v47 }
  0x8f   :  { %67 = vadd.xlane.f32.xlu2 %v941_v48  ;;  %148 = vadd.xlane.f32.xlu1 %v128_v51  ;;  %v74_v4 = vpop.xlane.xlu1 %73 }
  0x90   :  { %81 = vadd.xlane.f32.xlu0 %v956_v50  ;;  %v102_v3 = vmul.f32 %v1167_v25, %v74_v4 }
  0x92   :  { %v1242_v7 = vsub.f32 %v948_v14, %v102_v3 }
  0x94   :  { %v134_v9 = vmul.f32 %v1242_v7, %v1242_v7 }
  0x97   :  { %164 = vadd.xlane.f32.xlu2 %v136_v55  ;;  %162 = vadd.xlane.f32.xlu1 %v135_v56  ;;  %v84_v6 = vpop.xlane.xlu1 %83 }
  0x98   :  { %59 = vadd.xlane.f32.xlu0 %v933_v59  ;;  %v107_v11 = vmul.f32 %v1167_v25, %v84_v6 }
  0x9a   :  { %v1249_v2 = vsub.f32 %v957_v16, %v107_v11  ;;  %v925_v16 = vld [vmem:[%s1577_s3 + $0x38] sm:$0xff] }
  0x9b   :  { %490 = vmatpush.bf16.msra.mxu0 %v925_v16  ;;  %1012 = vmatpush.bf16.msra.mxu1 %v925_v16 }
  0x9c   :  { %v139_v12 = vmul.f32 %v1249_v2, %v1249_v2  ;;  %1013 = vmatpush.bf16.msra.mxu2 %v925_v16  ;;  %1014 = vmatpush.bf16.msra.mxu3 %v925_v16 }
  0x9f   :  { %150 = vadd.xlane.f32.xlu2 %v129_v62  ;;  %v66_v8 = vpop.xlane.xlu1 %65  ;;  %491 = vmatpush.bf16.msra.mxu0 %v924_v19 }
  0xa0   :  { %156 = vadd.xlane.f32.xlu0 %v132_v1  ;;  %v98_v13 = vmul.f32 %v1167_v25, %v66_v8  ;;  %1015 = vmatpush.bf16.msra.mxu1 %v924_v19 }
  0xa1   :  { %1016 = vmatpush.bf16.msra.mxu2 %v924_v19  ;;  %1017 = vmatpush.bf16.msra.mxu3 %v924_v19 }
  0xa2   :  { %v1256_v10 = vsub.f32 %v940_v18, %v98_v13  ;;  %v923_v18 = vld [vmem:[%s1577_s3 + $0x28] sm:$0xff] }
  0xa3   :  { %492 = vmatpush.bf16.msra.mxu0 %v923_v18 }
  0xa4   :  { %v130_v14 = vmul.f32 %v1256_v10, %v1256_v10  ;;  %1018 = vmatpush.bf16.msra.mxu1 %v923_v18 }
  0xa5   :  { %1019 = vmatpush.bf16.msra.mxu2 %v923_v18  ;;  %1020 = vmatpush.bf16.msra.mxu3 %v923_v18 }
  0xa7   :  { %493 = vmatpush.bf16.msra.mxu0 %v922_v20 }
  0xa8   :  { %166 = vadd.xlane.f32.xlu0 %v137_v0  ;;  %1021 = vmatpush.bf16.msra.mxu1 %v922_v20 }
  0xa9   :  { %1022 = vmatpush.bf16.msra.mxu2 %v922_v20  ;;  %1023 = vmatpush.bf16.msra.mxu3 %v922_v20 }
  0xab   :  { %494 = vmatpush.bf16.msra.mxu0 %v921_v21 }
  0xac   :  { %1024 = vmatpush.bf16.msra.mxu1 %v921_v21 }
  0xad   :  { %1025 = vmatpush.bf16.msra.mxu2 %v921_v21  ;;  %1026 = vmatpush.bf16.msra.mxu3 %v921_v21 }
  0xaf   :  { %495 = vmatpush.bf16.msra.mxu0 %v920_v22 }
  0xb0   :  { %160 = vadd.xlane.f32.xlu0 %v134_v9  ;;  %1027 = vmatpush.bf16.msra.mxu1 %v920_v22 }
  0xb1   :  { %1028 = vmatpush.bf16.msra.mxu2 %v920_v22  ;;  %1029 = vmatpush.bf16.msra.mxu3 %v920_v22 }
  0xb3   :  { %496 = vmatpush.bf16.msra.mxu0 %v919_v23 }
  0xb4   :  { %1030 = vmatpush.bf16.msra.mxu1 %v919_v23 }
  0xb5   :  { %1031 = vmatpush.bf16.msra.mxu2 %v919_v23  ;;  %1032 = vmatpush.bf16.msra.mxu3 %v919_v23 }
  0xb7   :  { %497 = vmatpush.bf16.msra.mxu0 %v918_v28 }
  0xb8   :  { %170 = vadd.xlane.f32.xlu0 %v139_v12  ;;  %1033 = vmatpush.bf16.msra.mxu1 %v918_v28 }
  0xb9   :  { %1034 = vmatpush.bf16.msra.mxu2 %v918_v28  ;;  %1035 = vmatpush.bf16.msra.mxu3 %v918_v28 }
  0xc0   :  { %152 = vadd.xlane.f32.xlu0 %v130_v14 }
  0xf2   :  { %v141_v24 = vpop.xlane.xlu2 %140 }
  0xf3   :  { %v172_v26 = vmul.f32 %v141_v24, %v1167_v25 }
  0xf5   :  { %v188_v27 = vadd.f32 1e-05, %v172_v26 }
  0xf7   :  { %1043 = vrsqrt.f32 %v188_v27  ;;  %vm210_vm2 = vweird.f32 %v188_v27 }
  0xf9   :  { %v159_v29 = vpop.xlane.xlu1 %158 }
  0xfa   :  { %v58_v31 = vpop.xlane.xlu2 %57  ;;  %v181_v32 = vmul.f32 %v159_v29, %v1167_v25  ;;  %v143_v35 = vpop.xlane.xlu0 %142  ;;  %v1345_v29 = vld [vmem:[%s1575_s1] ss:$0 sm:$0xff] }
  0xfb   :  { %v94_v33 = vmul.f32 %v1167_v25, %v58_v31  ;;  %v173_v36 = vmul.f32 %v143_v35, %v1167_v25 }
  0xfc   :  { %v1292_v44 = vadd.f32 1e-05, %v181_v32 }
  0xfd   :  { %v1044_v37 = vpop.eup %1043  ;;  %v1290_v41 = vsub.f32 %v932_v40, %v94_v33  ;;  %v189_v43 = vadd.f32 1e-05, %v173_v36 }
  0xfe   :  { %v205_v42 = vmul.f32 %v1044_v37, %v188_v27  ;;  %vm211_vm1 = vweird.f32 %v1044_v37  ;;  %vm300_vm7 = vweird.f32 %v1292_v44 }
  0xff   :  { %v126_v45 = vmul.f32 %v1290_v41, %v1290_v41  ;;  %1045 = vrsqrt.f32 %v189_v43  ;;  %vm1318_vm3 = vmor %vm210_vm2, %vm211_vm1  ;;  %vm220_vm5 = vweird.f32 %v189_v43 }
 0x100   :  { %v206_v46 = vmul.f32 %v1044_v37, %v205_v42  ;;  %1047 = vrsqrt.f32 %v1292_v44 }
 0x101   :  { %144 = vadd.xlane.f32.xlu1 %v126_v45  ;;  %v1359_v45 = vld [vmem:[%s1576_s2] ss:$0 sm:$0xff] }
 0x102   :  { %v207_v49 = vmul.f32 0.5, %v206_v46  ;;  %v68_v51 = vpop.xlane.xlu2 %67  ;;  %v149_v54 = vpop.xlane.xlu1 %148 }
 0x103   :  { %v99_v55 = vmul.f32 %v1167_v25, %v68_v51  ;;  %v176_v40 = vmul.f32 %v149_v54, %v1167_v25  ;;  %v82_v56 = vpop.xlane.xlu0 %81 }
 0x104   :  { %v106_v57 = vmul.f32 %v1167_v25, %v82_v56  ;;  %v208_v58 = vsub.f32 1.5, %v207_v49 }
 0x105   :  { %v1302_v62 = vsub.f32 %v941_v48, %v99_v55  ;;  %v1304_v63 = vadd.f32 1e-05, %v176_v40  ;;  %v1046_v1 = vpop.eup %1045 }
 0x106   :  { %v1308_v4 = vsub.f32 %v956_v50, %v106_v57  ;;  %v215_v0 = vmul.f32 %v1046_v1, %v189_v43  ;;  %v1315_v9 = vpop.eup %1047  ;;  %v209_v17 = vmul.f32 %v1044_v37, %v208_v58  ;;  %vm221_vm4 = vweird.f32 %v1046_v1 }
 0x107   :  { %1049 = vrsqrt.f32 %v1304_v63  ;;  %v131_v3 = vmul.f32 %v1302_v62, %v1302_v62  ;;  %v295_v14 = vmul.f32 %v1315_v9, %v1292_v44  ;;  %vm222_vm6 = vmor %vm220_vm5, %vm221_vm4  ;;  %vm301_vm8 = vweird.f32 %v1315_v9 }
 0x108   :  { %v138_v6 = vmul.f32 %v1308_v4, %v1308_v4  ;;  %v216_v48 = vmul.f32 %v1046_v1, %v215_v0  ;;  %v213_v22 = vsel %vm1318_vm3, %v1044_v37, %v209_v17  ;;  %vm250_vm9 = vweird.f32 %v1304_v63  ;;  %vm1377_vm11 = vmor %vm300_vm7, %vm301_vm8 }
 0x109   :  { %154 = vadd.xlane.f32.xlu1 %v131_v3  ;;  %v364_v28 = vmul.f32 %v213_v22, %v1170_v30  ;;  %v296_v31 = vmul.f32 %v1315_v9, %v295_v14 }
 0x10a   :  { %168 = vadd.xlane.f32.xlu2 %v138_v6  ;;  %v165_v11 = vpop.xlane.xlu2 %164  ;;  %v163_v15 = vpop.xlane.xlu1 %162  ;;  %v217_v50 = vmul.f32 0.5, %v216_v48 }
 0x10b   :  { %v184_v8 = vmul.f32 %v165_v11, %v1167_v25  ;;  %v60_v12 = vpop.xlane.xlu0 %59  ;;  %v183_v21 = vmul.f32 %v163_v15, %v1167_v25  ;;  %v383_v42 = vmul.f32 %v1345_v29, %v364_v28  ;;  %v297_v49 = vmul.f32 0.5, %v296_v31 }
 0x10c   :  { %v95_v16 = vmul.f32 %v1167_v25, %v60_v12  ;;  %v218_v18 = vsub.f32 1.5, %v217_v50 }
 0x10d   :  { %v1325_v19 = vpop.eup %1049  ;;  %v1327_v20 = vadd.f32 1e-05, %v184_v8  ;;  %v1348_v34 = vadd.f32 1e-05, %v183_v21  ;;  %v402_v40 = vadd.f32 %v1359_v45, %v383_v42  ;;  %v298_v57 = vsub.f32 1.5, %v297_v49 }
 0x10e   :  { %v245_v23 = vmul.f32 %v1325_v19, %v1304_v63  ;;  %v1336_v24 = vsub.f32 %v933_v59, %v95_v16  ;;  %v219_v26 = vmul.f32 %v1046_v1, %v218_v18  ;;  %vm251_vm10 = vweird.f32 %v1325_v19 }
 0x10f   :  { %1051 = vrsqrt.f32 %v1327_v20  ;;  %v299_v11 = vmul.f32 %v1315_v9, %v298_v57  ;;  %vm1384_vm12 = vmor %vm250_vm9, %vm251_vm10  ;;  %vm330_vm1 = vweird.f32 %v1327_v20  ;;  %vm320_vm8 = vweird.f32 %v1348_v34 }
 0x110   :  { %v127_v27 = vmul.f32 %v1336_v24, %v1336_v24  ;;  %v223_v59 = vsel %vm222_vm6, %v1046_v1, %v219_v26  ;;  %v246_v32 = vmul.f32 %v1325_v19, %v245_v23  ;;  %1053 = vrsqrt.f32 %v1348_v34 }
 0x111   :  { %v365_v35 = vmul.f32 %v223_v59, %v1183_v39  ;;  %v303_v22 = vsel %vm1377_vm11, %v1315_v9, %v299_v11 }
 0x112   :  { %146 = vadd.xlane.f32.xlu2 %v127_v27  ;;  %v151_v33 = vpop.xlane.xlu2 %150  ;;  %v247_v51 = vmul.f32 0.5, %v246_v32 }
 0x113   :  { %v177_v36 = vmul.f32 %v151_v33, %v1167_v25  ;;  %v157_v37 = vpop.xlane.xlu0 %156  ;;  %v384_v43 = vmul.f32 %v1345_v29, %v365_v35 }
 0x114   :  { %v180_v30 = vmul.f32 %v157_v37, %v1167_v25  ;;  %v248_v58 = vsub.f32 1.5, %v247_v51 }
 0x115   :  { %v1361_v46 = vpop.eup %1051  ;;  %v193_v39 = vadd.f32 1e-05, %v177_v36  ;;  %v403_v56 = vadd.f32 %v1359_v45, %v384_v43  ;;  %v373_v43 = vmul.f32 %v303_v22, %v1181_v38 }
 0x116   :  { %v196_v54 = vadd.f32 1e-05, %v180_v30  ;;  %v325_v55 = vmul.f32 %v1361_v46, %v1327_v20  ;;  %v1368_v0 = vpop.eup %1053  ;;  %v249_v44 = vmul.f32 %v1325_v19, %v248_v58  ;;  %vm331_vm2 = vweird.f32 %v1361_v46 }
 0x117   :  { %1055 = vrsqrt.f32 %v193_v39  ;;  %v418_v1 = vpack.c.bf16 %v403_v56, %v402_v40  ;;  %v315_v8 = vmul.f32 %v1368_v0, %v1348_v34  ;;  %vm260_vm13 = vweird.f32 %v193_v39  ;;  %vm1406_vm5 = vmor %vm330_vm1, %vm331_vm2 }
 0x118   :  { %1057 = vrsqrt.f32 %v196_v54  ;;  %v326_v3 = vmul.f32 %v1361_v46, %v325_v55  ;;  %v253_v27 = vsel %vm1384_vm12, %v1325_v19, %v249_v44  ;;  %vm290_vm15 = vweird.f32 %v196_v54 }
 0x119   :  { %498 = vmatmul.bf16.vlgmr.msra.gmra.mxu0 %v418_v1  ;;  %v316_v23 = vmul.f32 %v1368_v0, %v315_v8  ;;  %v368_v19 = vmul.f32 %v253_v27, %v1194_v47  ;;  %v392_v58 = vmul.f32 %v1345_v29, %v373_v43  ;;  %vm321_vm9 = vweird.f32 %v1368_v0 }
 0x11a   :  { %v327_v14 = vmul.f32 0.5, %v326_v3  ;;  %vm1431_vm11 = vmor %vm320_vm8, %vm321_vm9 }
 0x11b   :  { %v167_v6 = vpop.xlane.xlu0 %166  ;;  %v317_v37 = vmul.f32 0.5, %v316_v23  ;;  %v387_v40 = vmul.f32 %v1345_v29, %v368_v19  ;;  %v411_v50 = vadd.f32 %v1359_v45, %v392_v58 }
 0x11c   :  { %v185_v17 = vmul.f32 %v167_v6, %v1167_v25  ;;  %v328_v28 = vsub.f32 1.5, %v327_v14 }
 0x11d   :  { %v1056_v48 = vpop.eup %1055  ;;  %v318_v57 = vsub.f32 1.5, %v317_v37 }
 0x11e   :  { %v1058_v15 = vpop.eup %1057  ;;  %v255_v12 = vmul.f32 %v1056_v48, %v193_v39  ;;  %v201_v63 = vadd.f32 1e-05, %v185_v17  ;;  %vm261_vm14 = vweird.f32 %v1056_v48  ;;  %v329_v49 = vmul.f32 %v1361_v46, %v328_v28 }
 0x11f   :  { %v285_v16 = vmul.f32 %v1058_v15, %v196_v54  ;;  %vm291_vm0 = vweird.f32 %v1058_v15  ;;  %vm1399_vm3 = vmor %vm260_vm13, %vm261_vm14 }
 0x120   :  { %v256_v18 = vmul.f32 %v1056_v48, %v255_v12  ;;  %1059 = vrsqrt.f32 %v201_v63  ;;  %vm292_vm4 = vmor %vm290_vm15, %vm291_vm0  ;;  %vm340_vm6 = vweird.f32 %v201_v63  ;;  %v333_v6 = vsel %vm1406_vm5, %v1361_v46, %v329_v49 }
 0x121   :  { %v286_v21 = vmul.f32 %v1058_v15, %v285_v16  ;;  %v376_v44 = vmul.f32 %v333_v6, %v1203_v52  ;;  %v319_v46 = vmul.f32 %v1368_v0, %v318_v57 }
 0x122   :  { %v257_v26 = vmul.f32 0.5, %v256_v18 }
 0x123   :  { %v287_v31 = vmul.f32 0.5, %v286_v21  ;;  %v161_v59 = vpop.xlane.xlu0 %160  ;;  %v395_v52 = vmul.f32 %v1345_v29, %v376_v44  ;;  %v323_v34 = vsel %vm1431_vm11, %v1368_v0, %v319_v46 }
 0x124   :  { %v258_v32 = vsub.f32 1.5, %v257_v26  ;;  %v182_v33 = vmul.f32 %v161_v59, %v1167_v25 }
 0x125   :  { %v288_v35 = vsub.f32 1.5, %v287_v31  ;;  %v414_v27 = vadd.f32 %v1359_v45, %v395_v52  ;;  %v375_v31 = vmul.f32 %v323_v34, %v1207_v53 }
 0x126   :  { %v1060_v36 = vpop.eup %1059  ;;  %v259_v30 = vmul.f32 %v1056_v48, %v258_v32  ;;  %v198_v42 = vadd.f32 1e-05, %v182_v33 }
 0x127   :  { %v289_v20 = vmul.f32 %v1058_v15, %v288_v35  ;;  %v335_v51 = vmul.f32 %v1060_v36, %v201_v63  ;;  %vm341_vm7 = vweird.f32 %v1060_v36  ;;  %v394_v9 = vmul.f32 %v1345_v29, %v375_v31 }
 0x128   :  { %1061 = vrsqrt.f32 %v198_v42  ;;  %v263_v54 = vsel %vm1399_vm3, %v1056_v48, %v259_v30  ;;  %v406_v48 = vadd.f32 %v1359_v45, %v387_v40  ;;  %vm342_vm10 = vmor %vm340_vm6, %vm341_vm7  ;;  %vm310_vm12 = vweird.f32 %v198_v42 }
 0x129   :  { %v336_v47 = vmul.f32 %v1060_v36, %v335_v51  ;;  %v369_v55 = vmul.f32 %v263_v54, %v1220_v60  ;;  %v293_v56 = vsel %vm292_vm4, %v1058_v15, %v289_v20  ;;  %v413_v19 = vadd.f32 %v1359_v45, %v394_v9 }
 0x12a   :  { %v372_v38 = vmul.f32 %v293_v56, %v1224_v61 }
 0x12b   :  { %v337_v1 = vmul.f32 0.5, %v336_v47  ;;  %v388_v3 = vmul.f32 %v1345_v29, %v369_v55  ;;  %v171_v37 = vpop.xlane.xlu0 %170 }
 0x12c   :  { %v391_v60 = vmul.f32 %v1345_v29, %v372_v38  ;;  %v187_v53 = vmul.f32 %v171_v37, %v1167_v25 }
 0x12d   :  { %v338_v17 = vsub.f32 1.5, %v337_v1  ;;  %v407_v61 = vadd.f32 %v1359_v45, %v388_v3 }
 0x12e   :  { %v1062_v11 = vpop.eup %1061  ;;  %v410_v15 = vadd.f32 %v1359_v45, %v391_v60  ;;  %v203_v43 = vadd.f32 1e-05, %v187_v53 }
 0x12f   :  { %v339_v8 = vmul.f32 %v1060_v36, %v338_v17  ;;  %v305_v12 = vmul.f32 %v1062_v11, %v198_v42  ;;  %v420_v63 = vpack.c.bf16 %v407_v61, %v406_v48  ;;  %vm311_vm13 = vweird.f32 %v1062_v11 }
 0x130   :  { %v422_v14 = vpack.c.bf16 %v411_v50, %v410_v15  ;;  %vm312_vm14 = vmor %vm310_vm12, %vm311_vm13  ;;  %1063 = vrsqrt.f32 %v203_v43  ;;  %vm360_vm15 = vweird.f32 %v203_v43 }
 0x131   :  { %v306_v16 = vmul.f32 %v1062_v11, %v305_v12  ;;  %508 = vmatmul.bf16.vlgmr.msra.gmra.mxu1 %v420_v63  ;;  %v343_v18 = vsel %vm342_vm10, %v1060_v36, %v339_v8 }
 0x132   :  { %518 = vmatmul.bf16.vlgmr.msra.gmra.mxu2 %v422_v14  ;;  %v377_v21 = vmul.f32 %v343_v18, %v1235_v5 }
 0x133   :  { %v307_v22 = vmul.f32 0.5, %v306_v16  ;;  %v153_v30 = vpop.xlane.xlu0 %152 }
 0x134   :  { %v396_v23 = vmul.f32 %v1345_v29, %v377_v21  ;;  %v178_v42 = vmul.f32 %v153_v30, %v1167_v25 }
 0x135   :  { %v308_v26 = vsub.f32 1.5, %v307_v22 }
 0x136   :  { %v415_v28 = vadd.f32 %v1359_v45, %v396_v23  ;;  %v194_v49 = vadd.f32 1e-05, %v178_v42  ;;  %v1064_v20 = vpop.eup %1063 }
 0x137   :  { %v309_v5 = vmul.f32 %v1062_v11, %v308_v26  ;;  %v355_v47 = vmul.f32 %v1064_v20, %v203_v43  ;;  %vm361_vm0 = vweird.f32 %v1064_v20 }
 0x138   :  { %v424_v59 = vpack.c.bf16 %v415_v28, %v414_v27  ;;  %1065 = vrsqrt.f32 %v194_v49  ;;  %vm270_vm1 = vweird.f32 %v194_v49  ;;  %vm1463_vm3 = vmor %vm360_vm15, %vm361_vm0 }
 0x139   :  { %v313_v32 = vsel %vm312_vm14, %v1062_v11, %v309_v5  ;;  %v356_v40 = vmul.f32 %v1064_v20, %v355_v47 }
 0x13a   :  { %528 = vmatmul.bf16.vlgmr.msra.gmra.mxu3 %v424_v59  ;;  %v374_v33 = vmul.f32 %v313_v32, %v1242_v7 }
 0x13b   :  { %v357_v6 = vmul.f32 0.5, %v356_v40 }
 0x13c   :  { %v393_v0 = vmul.f32 %v1345_v29, %v374_v33 }
 0x13d   :  { %v358_v11 = vsub.f32 1.5, %v357_v6 }
 0x13e   :  { %v412_v35 = vadd.f32 %v1359_v45, %v393_v0  ;;  %v1066_v39 = vpop.eup %1065 }
 0x13f   :  { %v265_v55 = vmul.f32 %v1066_v39, %v194_v49  ;;  %vm271_vm2 = vweird.f32 %v1066_v39  ;;  %v359_v12 = vmul.f32 %v1064_v20, %v358_v11 }
 0x140   :  { %v423_v36 = vpack.c.bf16 %v413_v19, %v412_v35  ;;  %vm1467_vm4 = vmor %vm270_vm1, %vm271_vm2 }
 0x141   :  { %v266_v56 = vmul.f32 %v1066_v39, %v265_v55  ;;  %v363_v23 = vsel %vm1463_vm3, %v1064_v20, %v359_v12 }
 0x142   :  { %523 = vmatmul.bf16.gmra.mxu2 %v423_v36  ;;  %v379_v59 = vmul.f32 %v363_v23, %v1249_v2 }
 0x143   :  { %v267_v48 = vmul.f32 0.5, %v266_v56 }
 0x144   :  { %v398_v49 = vmul.f32 %v1345_v29, %v379_v59 }
 0x145   :  { %v268_v15 = vsub.f32 1.5, %v267_v48 }
 0x146   :  { %v417_v56 = vadd.f32 %v1359_v45, %v398_v49 }
 0x147   :  { %v269_v16 = vmul.f32 %v1066_v39, %v268_v15  ;;  %v1078_v15 = vmov 0.0  }
 0x148   :  { %831 = vst [vmem:[%s1578_s4 + $0x8] sm:$0xff] %v1078_v15 }
 0x149   :  { %v273_v28 = vsel %vm1467_vm4, %v1066_v39, %v269_v16  ;;  %832 = vst [vmem:[%s1578_s4 + $0x10] sm:$0xff] %v1078_v15 }
 0x14a   :  { %v370_v9 = vmul.f32 %v273_v28, %v1256_v10  ;;  %833 = vst [vmem:[%s1578_s4 + $0x18] sm:$0xff] %v1078_v15 }
 0x14b   :  { %834 = vst [vmem:[%s1578_s4 + $0x20] sm:$0xff] %v1078_v15 }
 0x14c   :  { %v389_v53 = vmul.f32 %v1345_v29, %v370_v9  ;;  %835 = vst [vmem:[%s1578_s4 + $0x28] sm:$0xff] %v1078_v15 }
 0x14d   :  { %836 = vst [vmem:[%s1578_s4 + $0x30] sm:$0xff] %v1078_v15 }
 0x14e   :  { %837 = vst [vmem:[%s1578_s4 + $0x38] sm:$0xff] %v1078_v15 }
 0x14f   :  { %838 = vst [vmem:[%s1578_s4 + $0x40] sm:$0xff] %v1078_v15 }
 0x150   :  { %839 = vst [vmem:[%s1578_s4 + $0x48] sm:$0xff] %v1078_v15 }
 0x151   :  { %840 = vst [vmem:[%s1578_s4 + $0x50] sm:$0xff] %v1078_v15 }
 0x152   :  { %841 = vst [vmem:[%s1578_s4 + $0x58] sm:$0xff] %v1078_v15 }
 0x153   :  { %842 = vst [vmem:[%s1578_s4 + $0x60] sm:$0xff] %v1078_v15 }
 0x154   :  { %843 = vst [vmem:[%s1578_s4 + $0x68] sm:$0xff] %v1078_v15 }
 0x155   :  { %844 = vst [vmem:[%s1578_s4 + $0x70] sm:$0xff] %v1078_v15 }
 0x156   :  { %845 = vst [vmem:[%s1578_s4 + $0x78] sm:$0xff] %v1078_v15 }
 0x174   :  { %v145_v7 = vpop.xlane.xlu1 %144 }
 0x175   :  { %v174_v51 = vmul.f32 %v145_v7, %v1167_v25 }
 0x177   :  { %v1452_v54 = vadd.f32 1e-05, %v174_v51 }
 0x179   :  { %1067 = vrsqrt.f32 %v1452_v54  ;;  %vm230_vm7 = vweird.f32 %v1452_v54 }
 0x17c   :  { %v155_v57 = vpop.xlane.xlu1 %154 }
 0x17d   :  { %v169_v38 = vpop.xlane.xlu2 %168  ;;  %v179_v58 = vmul.f32 %v155_v57, %v1167_v25 }
 0x17e   :  { %v186_v1 = vmul.f32 %v169_v38, %v1167_v25 }
 0x17f   :  { %v1457_v3 = vpop.eup %1067  ;;  %v195_v60 = vadd.f32 1e-05, %v179_v58 }
 0x180   :  { %v202_v17 = vadd.f32 1e-05, %v186_v1  ;;  %v225_v61 = vmul.f32 %v1457_v3, %v1452_v54  ;;  %vm231_vm9 = vweird.f32 %v1457_v3  ;;  %v408_v54 = vadd.f32 %v1359_v45, %v389_v53 }
 0x181   :  { %1069 = vrsqrt.f32 %v195_v60  ;;  %vm280_vm5 = vweird.f32 %v195_v60  ;;  %vm232_vm13 = vmor %vm230_vm7, %vm231_vm9 }
 0x182   :  { %1071 = vrsqrt.f32 %v202_v17  ;;  %v226_v50 = vmul.f32 %v1457_v3, %v225_v61  ;;  %vm350_vm11 = vweird.f32 %v202_v17 }
 0x184   :  { %v227_v18 = vmul.f32 0.5, %v226_v50 }
 0x185   :  { %v147_v44 = vpop.xlane.xlu2 %146 }
 0x186   :  { %v175_v46 = vmul.f32 %v147_v44, %v1167_v25  ;;  %v228_v26 = vsub.f32 1.5, %v227_v18 }
 0x187   :  { %v1070_v8 = vpop.eup %1069 }
 0x188   :  { %v191_v63 = vadd.f32 1e-05, %v175_v46  ;;  %v1072_v13 = vpop.eup %1071  ;;  %v275_v21 = vmul.f32 %v1070_v8, %v195_v60  ;;  %vm281_vm6 = vweird.f32 %v1070_v8  ;;  %v229_v0 = vmul.f32 %v1457_v3, %v228_v26 }
 0x189   :  { %v345_v22 = vmul.f32 %v1072_v13, %v202_v17  ;;  %vm351_vm8 = vweird.f32 %v1072_v13  ;;  %vm282_vm10 = vmor %vm280_vm5, %vm281_vm6 }
 0x18a   :  { %1073 = vrsqrt.f32 %v191_v63  ;;  %v276_v25 = vmul.f32 %v1070_v8, %v275_v21  ;;  %vm352_vm12 = vmor %vm350_vm11, %vm351_vm8  ;;  %v233_v7 = vsel %vm232_vm13, %v1457_v3, %v229_v0  ;;  %vm240_vm15 = vweird.f32 %v191_v63 }
 0x18b   :  { %v346_v34 = vmul.f32 %v1072_v13, %v345_v22  ;;  %v366_v47 = vmul.f32 %v233_v7, %v1290_v41  ;;  %v763_v21 = vlaneseq }
 0x18c   :  { %v277_v27 = vmul.f32 0.5, %v276_v25 }
 0x18d   :  { %v347_v31 = vmul.f32 0.5, %v346_v34  ;;  %v385_v41 = vmul.f32 %v1345_v29, %v366_v47  ;;  %v764_v34 = vshrl.u32 %v763_v21, 7 }
 0x18e   :  { %v278_v5 = vsub.f32 1.5, %v277_v27 }
 0x18f   :  { %v348_v33 = vsub.f32 1.5, %v347_v31  ;;  %v404_v60 = vadd.f32 %v1359_v45, %v385_v41  ;;  %vm798_vm4 = vcmp.lt.s32.totalorder %v764_v34, 5 }
 0x190   :  { %v1074_v32 = vpop.eup %1073  ;;  %v279_v35 = vmul.f32 %v1070_v8, %v278_v5 }
 0x191   :  { %v235_v19 = vmul.f32 %v1074_v32, %v191_v63  ;;  %v349_v36 = vmul.f32 %v1072_v13, %v348_v33  ;;  %vm241_vm14 = vweird.f32 %v1074_v32 }
 0x192   :  { %v283_v30 = vsel %vm282_vm10, %v1070_v8, %v279_v35  ;;  %vm242_vm0 = vmor %vm240_vm15, %vm241_vm14 }
 0x193   :  { %v236_v37 = vmul.f32 %v1074_v32, %v235_v19  ;;  %v371_v2 = vmul.f32 %v283_v30, %v1302_v62  ;;  %v353_v42 = vsel %vm352_vm12, %v1072_v13, %v349_v36 }
 0x194   :  { %v378_v10 = vmul.f32 %v353_v42, %v1308_v4 }
 0x195   :  { %v237_v43 = vmul.f32 0.5, %v236_v37  ;;  %v390_v20 = vmul.f32 %v1345_v29, %v371_v2 }
 0x196   :  { %v397_v39 = vmul.f32 %v1345_v29, %v378_v10  ;;  %v1490_v40 = vpop.f32.mrf.mxu0 }
 0x197   :  { %v238_v51 = vsub.f32 1.5, %v237_v43  ;;  %v409_v62 = vadd.f32 %v1359_v45, %v390_v20  ;;  %v539_v57 = vmul.f32 %v1490_v40, %v1490_v40 }
 0x198   :  { %v416_v4 = vadd.f32 %v1359_v45, %v397_v39 }
 0x199   :  { %v239_v55 = vmul.f32 %v1074_v32, %v238_v51  ;;  %v421_v38 = vpack.c.bf16 %v409_v62, %v408_v54  ;;  %555 = vadd.xlane.f32.xlu2 %v539_v57 }
 0x19a   :  { %v425_v58 = vpack.c.bf16 %v417_v56, %v416_v4 }
 0x19b   :  { %v243_v1 = vsel %vm242_vm0, %v1074_v32, %v239_v55  ;;  %513 = vmatmul.bf16.gmra.mxu1 %v421_v38 }
 0x19c   :  { %v367_v3 = vmul.f32 %v243_v1, %v1336_v24  ;;  %533 = vmatmul.bf16.gmra.mxu3 %v425_v58 }
 0x19e   :  { %v386_v6 = vmul.f32 %v1345_v29, %v367_v3  ;;  %v501_v48 = vpop.f32.mrf.mxu0 }
 0x1a0   :  { %v405_v17 = vadd.f32 %v1359_v45, %v386_v6  ;;  %v1079_v45 = vmov 0.0|0.0  }
 0x1a1   :  { %v960_v50 = vunpack.c.l.bf16 %v1079_v45 }
 0x1a2   :  { %v419_v61 = vpack.c.bf16 %v405_v17, %v404_v60 }
 0x1a3   :  { %v966_v44 = vpack.c.bf16 %v960_v50, %v960_v50 }
 0x1a4   :  { %503 = vmatmul.bf16.gmra.mxu0 %v419_v61 }
 0x1a5   :  { %1005 = vst [vmem:[%s1579_s5 + $0x8] sm:$0xff] %v966_v44  }
 0x1a6   :  { %1006 = vst [vmem:[%s1579_s5 + $0x10] sm:$0xff] %v966_v44  }
 0x1a7   :  { %1007 = vst [vmem:[%s1579_s5 + $0x18] sm:$0xff] %v966_v44  }
 0x1a8   :  { %1008 = vst [vmem:[%s1579_s5 + $0x20] sm:$0xff] %v966_v44  }
 0x1a9   :  { %1009 = vst [vmem:[%s1579_s5 + $0x28] sm:$0xff] %v966_v44  }
 0x1aa   :  { %1010 = vst [vmem:[%s1579_s5 + $0x30] sm:$0xff] %v966_v44  }
 0x1ab   :  { %1011 = vst [vmem:[%s1579_s5 + $0x38] sm:$0xff] %v966_v44  }
 0x1ae   :  { %v509_v11 = vpop.f32.mrf.mxu1 }
 0x1b5   :  { %v519_v24 = vpop.f32.mrf.mxu2 }
 0x1b6   :  { %v511_v29 = vpop.f32.mrf.mxu1 }
 0x1bd   :  { %v521_v46 = vpop.f32.mrf.mxu2  ;;  %v529_v8 = vpop.f32.mrf.mxu3 }
 0x1c5   :  { %v524_v12 = vpop.f32.mrf.mxu2  ;;  %v531_v63 = vpop.f32.mrf.mxu3 }
 0x1cd   :  { %v526_v13 = vpop.f32.mrf.mxu2 }
 0x20c   :  { %v556_v14 = vpop.xlane.xlu2 %555 }
 0x20d   :  { %1075 = vrsqrt.f32 %v556_v14  ;;  %vm593_vm2 = vweird.f32 %v556_v14 }
 0x213   :  { %v1076_v16 = vpop.eup %1075 }
 0x214   :  { %v588_v18 = vmul.f32 %v1076_v16, %v556_v14  ;;  %vm594_vm1 = vweird.f32 %v1076_v16 }
 0x215   :  { %vm595_vm3 = vmor %vm593_vm2, %vm594_vm1 }
 0x216   :  { %v589_v52 = vmul.f32 %v1076_v16, %v588_v18 }
 0x218   :  { %v514_v22 = vpop.f32.mrf.mxu1  ;;  %v590_v25 = vmul.f32 0.5, %v589_v52 }
 0x21a   :  { %v591_v23 = vsub.f32 1.5, %v590_v25 }
 0x21c   :  { %v592_v26 = vmul.f32 %v1076_v16, %v591_v23 }
 0x21e   :  { %v596_v28 = vsel %vm595_vm3, %v1076_v16, %v592_v26 }
 0x21f   :  { %v534_v27 = vpop.f32.mrf.mxu3  ;;  %v747_v59 = vmul.f32 %v596_v28, %v1490_v40 }
 0x220   :  { %v516_v5 = vpop.f32.mrf.mxu1 }
 0x221   :  { %v504_v31 = vpop.f32.mrf.mxu0  ;;  %v814_v32 = vsel %vm798_vm4, %v747_v59, 0.0 }
 0x222   :  { %830 = vst [vmem:[%s1578_s4] sm:$0xff] %v814_v32  ;;  %v961_v33 = vpack.c.bf16 %v960_v50, %v814_v32 }
 0x224   :  { %962 = vst [vmem:[%s1579_s5] sm:$0xff] %v961_v33  }
 0x227   :  { %v536_v9 = vpop.f32.mrf.mxu3 }
 0x229   :  { %v506_v0 = vpop.f32.mrf.mxu0 }

// kernel: new_clip_forward.7
= control target key start
LH: loop header
LB: loop body
LE: loop exit
PB: predicated region body
PF: predicated region fallthrough
CT: control target
= control target key end

     0   :  { %14 = vsyncpa [#allocation4], 0  ;;  %vm32_vm0 = vcmask 1043456   ;;  %s533_s0 = inlined_call_operand.vmem [shape: bf16[4,128], index: 0, kind: input, shape index: {}]   ;;  %s534_s1 = inlined_call_operand.vmem [shape: f32[1,128], index: 1, kind: input, shape index: {}]   ;;  %s535_s2 = inlined_call_operand.vmem [shape: f32[1,128], index: 2, kind: input, shape index: {}]   ;;  %s536_s3 = inlined_call_operand.vmem [shape: bf16[128,128], index: 3, kind: input, shape index: {}]   ;;  %s537_s4 = inlined_call_operand.vmem [shape: bf16[128,128], index: 4, kind: input, shape index: {}]   ;;  %s538_s5 = inlined_call_operand.<no memory space> [shape: f32[1], index: 5, kind: input, shape index: {}]   ;;  %s539_s6 = inlined_call_operand.hbm [shape: f32[4,128], index: 6, kind: output, shape index: {0}]   ;;  %s540_s7 = inlined_call_operand.hbm [shape: f32[4,128], index: 7, kind: output, shape index: {1}]  }
   0x1   :  { %v28_v0 = vld [vmem:[%s533_s0] sm:$0x3] }
   0x2   :  { %v29_v1 = vunpack.c.l.bf16 %v28_v0 }
   0x3   :  { %15 = vsyncpa [#allocation6], 0  ;;  %v421_v3 = vmov 128.0   ;;  %v349_v4 = vld [vmem:[%s536_s3 + $0x38] sm:$0xff]  ;;  %v348_v16 = vld [vmem:[%s536_s3 + $0x30] sm:$0xff]  ;;  %s422_s11 = smov [#allocation5]   ;;  %v243_v61 = vstv %s538_s5 }
   0x4   :  { %v33_v2 = vsel %vm32_vm0, %v29_v1, 0.0  ;;  %363 = vrcp.f32 %v421_v3  ;;  %135 = vmatpush.bf16.msra.mxu0 %v349_v4  ;;  %v347_v17 = vld [vmem:[%s536_s3 + $0x28] sm:$0xff]  ;;  %v346_v18 = vld [vmem:[%s536_s3 + $0x20] sm:$0xff]  ;;  %v345_v19 = vld [vmem:[%s536_s3 + $0x18] sm:$0xff]  ;;  %s262_s12 = sshll.u32 %s422_s11, 4  ;;  %s264_s14 = sshll.u32 %s540_s7, 4  ;;  %s263_s12 = int_to_ptr.vmem [resolvable:$true] %s262_s12  ;;  %s265_s14 = int_to_ptr.hbm [resolvable:$true] %s264_s14 }
   0x5   :  { %34 = vadd.xlane.f32.xlu0 %v33_v2  ;;  %v344_v20 = vld [vmem:[%s536_s3 + $0x10] sm:$0xff]  ;;  %v343_v21 = vld [vmem:[%s536_s3 + $0x8] sm:$0xff]  ;;  %v342_v22 = vld [vmem:[%s536_s3] sm:$0xff]  ;;  %s423_s17 = smov [#allocation3]   ;;  %s253_s20 = sshll.u32 %s539_s6, 4  ;;  %s254_s20 = int_to_ptr.hbm [resolvable:$true] %s253_s20 }
   0x6   :  { %v361_v32 = vld [vmem:[%s534_s1] ss:$0 sm:$0xff]  ;;  %v357_v39 = vld [vmem:[%s537_s4 + $0x38] sm:$0xff]  ;;  %v356_v40 = vld [vmem:[%s537_s4 + $0x30] sm:$0xff]  ;;  %s251_s18 = sshll.u32 %s423_s17, 4  ;;  %s252_s18 = int_to_ptr.vmem [resolvable:$true] %s251_s18 }
   0x7   :  { %v362_v35 = vld [vmem:[%s535_s2] ss:$0 sm:$0xff]  ;;  %230 = vmatpush.bf16.xpose.msra.mxu1 %v357_v39  ;;  %v355_v41 = vld [vmem:[%s537_s4 + $0x28] sm:$0xff]  ;;  %v353_v46 = vld [vmem:[%s537_s4 + $0x18] sm:$0xff] }
   0x8   :  { %136 = vmatpush.bf16.msra.mxu0 %v348_v16  ;;  %v354_v42 = vld [vmem:[%s537_s4 + $0x20] sm:$0xff]  ;;  %v352_v48 = vld [vmem:[%s537_s4 + $0x10] sm:$0xff]  ;;  %v351_v49 = vld [vmem:[%s537_s4 + $0x8] sm:$0xff] }
   0x9   :  { %v350_v50 = vld [vmem:[%s537_s4] sm:$0xff] }
   0xa   :  { %v364_v5 = vpop.eup %363 }
   0xb   :  { %v37_v6 = vmul.f32 128.0, %v364_v5  ;;  %vm41_vm1 = vweird.f32 %v364_v5 }
   0xc   :  { %137 = vmatpush.bf16.msra.mxu0 %v347_v17 }
   0xd   :  { %v38_v7 = vsub.f32 1.0, %v37_v6 }
   0xf   :  { %v39_v8 = vmul.f32 %v364_v5, %v38_v7  ;;  %231 = vmatpush.bf16.xpose.msra.mxu1 %v356_v40 }
  0x10   :  { %138 = vmatpush.bf16.msra.mxu0 %v346_v18 }
  0x11   :  { %v40_v9 = vadd.f32 %v364_v5, %v39_v8 }
  0x13   :  { %v42_v10 = vsel %vm41_vm1, %v364_v5, %v40_v9 }
  0x14   :  { %139 = vmatpush.bf16.msra.mxu0 %v345_v19 }
  0x17   :  { %232 = vmatpush.bf16.xpose.msra.mxu1 %v355_v41 }
  0x18   :  { %140 = vmatpush.bf16.msra.mxu0 %v344_v20 }
  0x1c   :  { %141 = vmatpush.bf16.msra.mxu0 %v343_v21 }
  0x1f   :  { %233 = vmatpush.bf16.xpose.msra.mxu1 %v354_v42 }
  0x20   :  { %142 = vmatpush.bf16.msra.mxu0 %v342_v22 }
  0x27   :  { %234 = vmatpush.bf16.xpose.msra.mxu1 %v353_v46 }
  0x2f   :  { %235 = vmatpush.bf16.xpose.msra.mxu1 %v352_v48 }
  0x37   :  { %236 = vmatpush.bf16.xpose.msra.mxu1 %v351_v49 }
  0x3f   :  { %237 = vmatpush.bf16.xpose.msra.mxu1 %v350_v50 }
  0x78   :  { %v35_v11 = vpop.xlane.xlu0 %34 }
  0x79   :  { %v43_v12 = vmul.f32 %v42_v10, %v35_v11 }
  0x7b   :  { %v44_v13 = vsub.f32 %v29_v1, %v43_v12 }
  0x7d   :  { %v45_v14 = vmul.f32 %v44_v13, %v44_v13 }
  0x7f   :  { %v46_v15 = vsel %vm32_vm0, %v45_v14, 0.0 }
  0x80   :  { %47 = vadd.xlane.f32.xlu0 %v46_v15 }
  0xf3   :  { %v48_v23 = vpop.xlane.xlu0 %47 }
  0xf4   :  { %v49_v24 = vmul.f32 %v48_v23, %v42_v10 }
  0xf6   :  { %v50_v25 = vadd.f32 1e-05, %v49_v24 }
  0xf8   :  { %365 = vrsqrt.f32 %v50_v25  ;;  %vm57_vm3 = vweird.f32 %v50_v25 }
  0xfe   :  { %v366_v26 = vpop.eup %365 }
  0xff   :  { %v52_v27 = vmul.f32 %v366_v26, %v50_v25  ;;  %vm58_vm2 = vweird.f32 %v366_v26 }
 0x100   :  { %vm59_vm4 = vmor %vm57_vm3, %vm58_vm2 }
 0x101   :  { %v53_v28 = vmul.f32 %v366_v26, %v52_v27 }
 0x103   :  { %v54_v29 = vmul.f32 0.5, %v53_v28 }
 0x105   :  { %v55_v30 = vsub.f32 1.5, %v54_v29 }
 0x107   :  { %v56_v31 = vmul.f32 %v366_v26, %v55_v30 }
 0x109   :  { %v60_v33 = vsel %vm59_vm4, %v366_v26, %v56_v31 }
 0x10a   :  { %v61_v34 = vmul.f32 %v60_v33, %v44_v13 }
 0x10c   :  { %v65_v36 = vmul.f32 %v361_v32, %v61_v34 }
 0x10e   :  { %v69_v37 = vadd.f32 %v362_v35, %v65_v36 }
 0x110   :  { %v70_v38 = vpack.c.bf16 %v69_v37, %v69_v37 }
 0x112   :  { %143 = vmatmul.bf16.vlgmr.msra.gmra.mxu0 %v70_v38 }
 0x18f   :  { %v144_v43 = vpop.f32.mrf.mxu0 }
 0x190   :  { %v148_v44 = vmul.f32 %v144_v43, %v144_v43 }
 0x192   :  { %v149_v45 = vsel %vm32_vm0, %v148_v44, 0.0 }
 0x193   :  { %150 = vadd.xlane.f32.xlu1 %v149_v45 }
 0x197   :  { %v146_v47 = vpop.f32.mrf.mxu0 }
 0x206   :  { %v151_v51 = vpop.xlane.xlu1 %150 }
 0x207   :  { %367 = vrsqrt.f32 %v151_v51  ;;  %vm158_vm6 = vweird.f32 %v151_v51 }
 0x20d   :  { %v368_v52 = vpop.eup %367 }
 0x20e   :  { %v153_v53 = vmul.f32 %v368_v52, %v151_v51  ;;  %vm159_vm5 = vweird.f32 %v368_v52 }
 0x20f   :  { %vm160_vm7 = vmor %vm158_vm6, %vm159_vm5 }
 0x210   :  { %v154_v54 = vmul.f32 %v368_v52, %v153_v53 }
 0x212   :  { %v155_v55 = vmul.f32 0.5, %v154_v54 }
 0x214   :  { %v156_v56 = vsub.f32 1.5, %v155_v55 }
 0x216   :  { %v157_v57 = vmul.f32 %v368_v52, %v156_v56 }
 0x218   :  { %v161_v58 = vsel %vm160_vm7, %v368_v52, %v157_v57 }
 0x219   :  { %v162_v59 = vmul.f32 %v161_v58, %v144_v43 }
 0x21b   :  { %v165_v60 = vpack.c.bf16 %v162_v59, %v162_v59  ;;  %163 = vst [vmem:[#allocation5] sm:$0xf] %v162_v59 }
 0x21c   :  { %267 = dma.vmem_to_hbm [thread:$0]  %s263_s12, 64, %s265_s14, [#allocation6]  }
 0x21d   :  { %238 = vmatmul.bf16.vlgmr.msra.gmra.mxu1 %v165_v60 }
 0x29a   :  { %v239_v62 = vpop.f32.mrf.mxu1 }
 0x29b   :  { %v244_v63 = vmul.f32 %v243_v61, %v239_v62 }
 0x29d   :  { %245 = vst [vmem:[#allocation3] sm:$0xf] %v244_v63 }
 0x29e   :  { %256 = dma.vmem_to_hbm [thread:$0]  %s252_s18, 64, %s254_s20, [#allocation4]  }
 0x2a2   :  { %v241_v0 = vpop.f32.mrf.mxu1 }
 0x2a3   :  { %417 = dma.done.wait [#allocation4], 64  }
 0x2a4   :  { %418 = vsyncadd [#allocation4], 4294967232 }
 0x2a5   :  { %419 = dma.done.wait [#allocation6], 64  }
 0x2a6   :  { %420 = vsyncadd [#allocation6], 4294967232 }
 0x2a7   :  { %276 = vsyncpa [#allocation4], 1 }
 0x2a8   :  { %277 = vsyncpa [#allocation6], 1 }

</bundles_post_ra>
